<compile_context>
chip_gen: v7x
topology: tpu7x:2x2x1
jax: 0.10.0
libtpu: 0.0.40
codegen_flags: <defaults>
</compile_context>

<pallas_src>
import jax
import jax.numpy as jnp
from jax.experimental import pallas as pl
from jax.experimental.pallas import tpu as pltpu

# ---- module constants (from the PyTorch source) ----
N_GLOBAL_ACTIONS = 2
N_HOSTS = 13
N_HOST_ACTIONS = 11
ACTION_SPACE = N_HOST_ACTIONS * N_HOSTS + N_GLOBAL_ACTIONS  # 145

HIDDEN1 = 256
HIDDEN2 = 64
OUT_DIM = 1 + ACTION_SPACE  # lane 0 = critic value, lanes 1..145 = actor probs


# ----------------------------------------------------------------------------
# Fused per-observation kernel: adjacency build + host selection + 2x GCN + relu
#                               + fused critic/actor head + softmax
# Runs once per grid step (one observation); weights are grid-resident.
# ----------------------------------------------------------------------------
def fused_actor_critic_kernel(ei_ref, x_ref, w1_ref, b1_ref, w2_ref, b2_ref,
                              wh_ref, bh_ref, out_ref, zflat_ref):
    f32 = jnp.float32
    N = x_ref.shape[0]
    IN = x_ref.shape[1]
    E = ei_ref.shape[1]

    # ---- normalized adjacency  D^-1/2 (A + I) D^-1/2  (iota + one-hot matmul, no scatter) ----
    node_ids = jax.lax.broadcasted_iota(jnp.int32, (N, E), 0)
    src_oh = (node_ids == ei_ref[0:1, :]).astype(f32)               # (N, E)
    dst_oh = (node_ids == ei_ref[1:2, :]).astype(f32)               # (N, E)
    adj = jax.lax.dot_general(dst_oh, src_oh, (((1,), (1,)), ((), ())),
                              preferred_element_type=f32)           # (N, N): A[dst, src]
    adj = jnp.minimum(adj, 1.0)                                      # dedupe repeated edges

    row_n = jax.lax.broadcasted_iota(jnp.int32, (N, N), 0)
    col_n = jax.lax.broadcasted_iota(jnp.int32, (N, N), 1)
    eye = (row_n == col_n).astype(f32)
    adj = adj + eye                                                  # self loops

    deg = jnp.sum(adj, axis=1, keepdims=True)                        # (N, 1)
    dinv = jnp.where(deg > 0.0, jax.lax.rsqrt(deg), 0.0)             # (N, 1)
    dinv_row = jnp.sum(eye * dinv, axis=0, keepdims=True)            # (1, N) transpose via reduce
    a_norm = (adj * dinv) * dinv_row                                 # VPU scale, no diag matmul

    # ---- host-selection one-hot rows (x[:,0] == 1), ordered by node index ----
    e0 = (jax.lax.broadcasted_iota(jnp.int32, (1, IN), 1) == 0).astype(f32)
    col0 = jax.lax.dot_general(e0, x_ref[...], (((1,), (1,)), ((), ())),
                               preferred_element_type=f32)           # (1, N) == x[:, 0] as a row
    hosts = col0 == 1.0                                              # (1, N) bool
    hosts_f = hosts.astype(f32)
    lt = (row_n < col_n).astype(f32)                                 # strictly-lower mask
    rank = jnp.dot(hosts_f, lt, preferred_element_type=f32)          # (1, N) exclusive host count
    r_ids = jax.lax.broadcasted_iota(jnp.int32, (N_HOSTS, N), 0).astype(f32)
    sel = ((rank == r_ids) & hosts).astype(f32)                      # (N_HOSTS, N) one-hot rows

    # ---- GCN layer 1 (reassociated):  h1 = relu((A @ X) @ W1 + b1) ----
    ax = jnp.dot(a_norm, x_ref[...], preferred_element_type=f32)                     # (N, IN)
    h1 = jnp.maximum(jnp.dot(ax, w1_ref[...], preferred_element_type=f32)
                     + b1_ref[...], 0.0)                                             # (N, H1)

    # ---- GCN layer 2 with host selection hoisted before aggregation ----
    sa = jnp.dot(sel, a_norm, preferred_element_type=f32)                            # (13, N)
    sah1 = jnp.dot(sa, h1, preferred_element_type=f32)                               # (13, H1)
    z = jnp.maximum(jnp.dot(sah1, w2_ref[...], preferred_element_type=f32)
                    + b2_ref[...], 0.0)                                              # (13, H2)

    # ---- flatten z (13, 64) -> (1, 832) through VMEM scratch (cheap relayout) ----
    for h in range(N_HOSTS):
        zflat_ref[:, h * HIDDEN2:(h + 1) * HIDDEN2] = z[h:h + 1, :]
    z_flat = zflat_ref[...]                                          # (1, 832)

    # ---- fused critic+actor head: ONE 832-deep GEMV ----
    head = jnp.dot(z_flat, wh_ref[...], preferred_element_type=f32) + bh_ref[...]    # (1, OUT_DIM)

    # ---- masked softmax over the actor logits (lanes 1 .. ACTION_SPACE), exact normalization ----
    lane = jax.lax.broadcasted_iota(jnp.int32, (1, OUT_DIM), 1)
    is_logit = lane >= 1
    logits = jnp.where(is_logit, head, jnp.float32(-1e30))
    m = jnp.max(logits, axis=-1, keepdims=True)
    e = jnp.where(is_logit, jnp.exp(logits - m), 0.0)
    s = jnp.sum(e, axis=-1, keepdims=True)
    probs = e / s
    out_ref[...] = jnp.where(lane == 0, head, probs)                 # lane 0 = value, 1..145 = probs


def prepare_params(params):
    """One-time packing of the head weights (hoisted out of the per-call hot path).
    Head weight kept 2-D (832, 146) and unpadded to minimize HBM traffic."""
    wh = jnp.concatenate([params["wc"], params["wa"]], axis=1)       # (832, 146)
    bh = jnp.concatenate([params["bc"], params["ba"]], axis=1)       # (1, 146)
    return {"w1": params["w1"], "b1": params["b1"],
            "w2": params["w2"], "b2": params["b2"], "wh": wh, "bh": bh}


@jax.jit
def actor_critic_forward(x, ei, prep):
    """x: (B, N, in_dim) f32; ei: (B, 2, E) int edge index (src, dst); prep: prepare_params(...).

    Returns (value: (B,), probs: (B, ACTION_SPACE))."""
    B, N, IN = x.shape
    E = ei.shape[2]

    flops_per_step = (
        2 * N * N * E + 2 * N * IN + 2 * N * N + 2 * N * N * IN
        + 2 * N * IN * HIDDEN1 + 2 * N_HOSTS * N * N + 2 * N_HOSTS * N * HIDDEN1
        + 2 * N_HOSTS * HIDDEN1 * HIDDEN2 + 2 * N_HOSTS * HIDDEN2 * OUT_DIM)
    weight_bytes = 4 * sum(int(v.size) for v in prep.values())
    io_bytes = 4 * (int(x.size) + int(ei.size) + B * OUT_DIM)
    cost = pl.CostEstimate(flops=B * flops_per_step,
                           transcendentals=B * (OUT_DIM + N),
                           bytes_accessed=weight_bytes + io_bytes)

    const2 = lambda shape: pl.BlockSpec(shape, lambda b: (0, 0))

    out = pl.pallas_call(
        fused_actor_critic_kernel,
        out_shape=jax.ShapeDtypeStruct((B, 1, OUT_DIM), jnp.float32),
        grid=(B,),
        in_specs=[
            pl.BlockSpec((None, 2, E), lambda b: (b, 0, 0)),          # per-step edge index
            pl.BlockSpec((None, N, IN), lambda b: (b, 0, 0)),         # per-step features
            const2(prep["w1"].shape),                                 # weights: resident across grid
            const2(prep["b1"].shape),
            const2(prep["w2"].shape),
            const2(prep["b2"].shape),
            const2(prep["wh"].shape),
            const2(prep["bh"].shape),
        ],
        out_specs=pl.BlockSpec((None, 1, OUT_DIM), lambda b: (b, 0, 0)),
        scratch_shapes=[pltpu.VMEM((1, N_HOSTS * HIDDEN2), jnp.float32)],
        compiler_params=pltpu.CompilerParams(dimension_semantics=("parallel",)),
        cost_estimate=cost,
    )(ei.astype(jnp.int32), x,
      prep["w1"], prep["b1"], prep["w2"], prep["b2"], prep["wh"], prep["bh"])

    value = out[:, 0, 0]                                  # (B,)
    probs = out[:, 0, 1:1 + ACTION_SPACE]                 # (B, ACTION_SPACE) for Categorical
    return value, probs


# ----------------------------------------------------------------------------
# Pure-JAX reference (single observation, for correctness check)
# ----------------------------------------------------------------------------
def reference_forward(x, ei, params):
    N = x.shape[0]
    adj = jnp.zeros((N, N), jnp.float32).at[ei[1], ei[0]].set(1.0) + jnp.eye(N)
    deg = jnp.sum(adj, axis=1)
    dinv = jnp.where(deg > 0, 1.0 / jnp.sqrt(deg), 0.0)
    a_norm = adj * dinv[:, None] * dinv[None, :]

    h1 = jnp.maximum(a_norm @ (x @ params["w1"]) + params["b1"], 0.0)
    h2 = jnp.maximum(a_norm @ (h1 @ params["w2"]) + params["b2"], 0.0)
    host_idx = jnp.nonzero(x[:, 0] == 1.0, size=N_HOSTS)[0]
    z = h2[host_idx].reshape(1, -1)
    value = z @ params["wc"] + params["bc"]
    logits = z @ params["wa"] + params["ba"]
    probs = jax.nn.softmax(logits, axis=-1)
    return value.reshape(1), probs.reshape(ACTION_SPACE)


if __name__ == "__main__":
    IN_DIM = 8       # small feature dim
    N_NODES = 20     # 13 host nodes + 7 non-host nodes
    BATCH = 4        # observations processed per pallas_call (grid axis)

    key = jax.random.PRNGKey(0)
    keys = jax.random.split(key, 8)

    # ---- deterministic parameter init (shapes from __init__) ----
    params = {
        "w1": jax.random.normal(keys[0], (IN_DIM, HIDDEN1), jnp.float32) * 0.1,
        "b1": jax.random.normal(keys[1], (1, HIDDEN1), jnp.float32) * 0.01,
        "w2": jax.random.normal(keys[2], (HIDDEN1, HIDDEN2), jnp.float32) * 0.1,
        "b2": jax.random.normal(keys[3], (1, HIDDEN2), jnp.float32) * 0.01,
        "wc": jax.random.normal(keys[4], (HIDDEN2 * N_HOSTS, 1), jnp.float32) * 0.05,
        "bc": jax.random.normal(keys[5], (1, 1), jnp.float32) * 0.01,
        "wa": jax.random.normal(keys[6], (HIDDEN2 * N_HOSTS, ACTION_SPACE), jnp.float32) * 0.05,
        "ba": jax.random.normal(keys[7], (1, ACTION_SPACE), jnp.float32) * 0.01,
    }

    # ---- deterministic batch of observations (different features / hosts / chords per step) ----
    feat_keys = jax.random.split(jax.random.PRNGKey(1), BATCH)
    ring_src = jnp.arange(N_NODES, dtype=jnp.int32)
    ring_dst = (ring_src + 1) % N_NODES
    base_es = jnp.array([0, 5, 10, 3, 7], dtype=jnp.int32)
    base_ed = jnp.array([13, 15, 2, 18, 11], dtype=jnp.int32)

    xs, eis = [], []
    for b in range(BATCH):
        xb = jax.random.normal(feat_keys[b], (N_NODES, IN_DIM), jnp.float32)
        host_idx = (3 * b + jnp.arange(N_HOSTS)) % N_NODES          # exactly 13 hosts, shifted per step
        flag = jnp.zeros((N_NODES,), jnp.float32).at[host_idx].set(1.0)
        xb = xb.at[:, 0].set(flag)
        es = (base_es + b) % N_NODES
        ed = (base_ed + 2 * b) % N_NODES
        eib = jnp.stack([jnp.concatenate([ring_src, es]),
                         jnp.concatenate([ring_dst, ed])]).astype(jnp.int32)
        xs.append(xb)
        eis.append(eib)
    x = jnp.stack(xs)       # (B, N, IN)
    ei = jnp.stack(eis)     # (B, 2, E)

    prep = prepare_params(params)
    value, probs = actor_critic_forward(x, ei, prep)
    jax.block_until_ready((value, probs))

    for b in range(BATCH):
        ref_value, ref_probs = reference_forward(x[b], ei[b], params)
        assert jnp.allclose(value[b], ref_value, atol=3e-4, rtol=1e-3), (b, value[b], ref_value)
        assert jnp.allclose(probs[b], ref_probs, atol=1e-4, rtol=1e-3), b
        assert jnp.allclose(jnp.sum(probs[b]), 1.0, atol=1e-4), b

    # TODO(synk): Categorical distribution object (sampling/log_prob) has no Pallas
    # equivalent; the kernel returns the softmax probability vector instead.
    print("KERNEL_OK")
</pallas_src>

<mosaic_0001>
module attributes {stable_mosaic.version = 11 : i64} {
  func.func @fused_actor_critic_kernel(%arg0: i32, %arg1: memref<1x2x25xi32, #tpu.memory_space<vmem>>, %arg2: memref<1x20x8xf32, #tpu.memory_space<vmem>>, %arg3: memref<8x256xf32, #tpu.memory_space<vmem>>, %arg4: memref<1x256xf32, #tpu.memory_space<vmem>>, %arg5: memref<256x64xf32, #tpu.memory_space<vmem>>, %arg6: memref<1x64xf32, #tpu.memory_space<vmem>>, %arg7: memref<832x146xf32, #tpu.memory_space<vmem>>, %arg8: memref<1x146xf32, #tpu.memory_space<vmem>>, %arg9: memref<1x1x146xf32, #tpu.memory_space<vmem>>, %arg10: memref<1x832xf32, #tpu.memory_space<vmem>>) attributes {dimension_semantics = [#tpu.dimension_semantics<parallel>], iteration_bounds = array<i64: 4>, scalar_prefetch = 0 : i64, scratch_operands = 1 : i64, tpu.core_type = #tpu.core_type<tc>, window_params = [{transform_indices = @transform_0, window_bounds = array<i64: 1, 2, 25>}, {transform_indices = @transform_1, window_bounds = array<i64: 1, 20, 8>}, {pipeline_mode = #tpu.pipeline_mode<synchronous>, transform_indices = @transform_2, window_bounds = array<i64: 8, 256>}, {pipeline_mode = #tpu.pipeline_mode<synchronous>, transform_indices = @transform_3, window_bounds = array<i64: 1, 256>}, {pipeline_mode = #tpu.pipeline_mode<synchronous>, transform_indices = @transform_4, window_bounds = array<i64: 256, 64>}, {pipeline_mode = #tpu.pipeline_mode<synchronous>, transform_indices = @transform_5, window_bounds = array<i64: 1, 64>}, {pipeline_mode = #tpu.pipeline_mode<synchronous>, transform_indices = @transform_6, window_bounds = array<i64: 832, 146>}, {pipeline_mode = #tpu.pipeline_mode<synchronous>, transform_indices = @transform_7, window_bounds = array<i64: 1, 146>}, {transform_indices = @transform_8, window_bounds = array<i64: 1, 1, 146>}]} {
    %0 = tpu.iota {dimensions = array<i32: 0>} : vector<20x25xi32>
    %c0 = arith.constant 0 : index
    %c0_0 = arith.constant 0 : index
    %c0_1 = arith.constant 0 : index
    %1 = vector.load %arg1[%c0, %c0_0, %c0_1] : memref<1x2x25xi32, #tpu.memory_space<vmem>>, vector<1x1x25xi32>
    %2 = vector.shape_cast %1 : vector<1x1x25xi32> to vector<1x25xi32>
    %3 = vector.broadcast %2 : vector<1x25xi32> to vector<20x25xi32>
    %4 = arith.cmpi eq, %0, %3 : vector<20x25xi32>
    %5 = arith.extui %4 : vector<20x25xi1> to vector<20x25xi32>
    %6 = arith.sitofp %5 : vector<20x25xi32> to vector<20x25xf32>
    %c0_2 = arith.constant 0 : index
    %c1 = arith.constant 1 : index
    %c0_3 = arith.constant 0 : index
    %7 = vector.load %arg1[%c0_2, %c1, %c0_3] : memref<1x2x25xi32, #tpu.memory_space<vmem>>, vector<1x1x25xi32>
    %8 = vector.shape_cast %7 : vector<1x1x25xi32> to vector<1x25xi32>
    %9 = vector.broadcast %8 : vector<1x25xi32> to vector<20x25xi32>
    %10 = arith.cmpi eq, %0, %9 : vector<20x25xi32>
    %11 = arith.extui %10 : vector<20x25xi1> to vector<20x25xi32>
    %12 = arith.sitofp %11 : vector<20x25xi32> to vector<20x25xf32>
    %cst = arith.constant dense<0.000000e+00> : vector<20x20xf32>
    %13 = tpu.matmul %12, %6, %cst {dimension_numbers = #tpu.dot_dimension_numbers<[1], [1], [0], [0], [0, 0, 1, 0], [], []>} : vector<20x25xf32>, vector<20x25xf32>, vector<20x20xf32> -> vector<20x20xf32>
    %cst_4 = arith.constant 1.000000e+00 : f32
    %14 = vector.broadcast %cst_4 : f32 to vector<20x20xf32>
    %15 = arith.minimumf %13, %14 : vector<20x20xf32>
    %16 = tpu.iota {dimensions = array<i32: 0>} : vector<20x20xi32>
    %17 = tpu.iota {dimensions = array<i32: 1>} : vector<20x20xi32>
    %18 = arith.cmpi eq, %16, %17 : vector<20x20xi32>
    %19 = arith.extui %18 : vector<20x20xi1> to vector<20x20xi32>
    %20 = arith.sitofp %19 : vector<20x20xi32> to vector<20x20xf32>
    %21 = arith.addf %15, %20 : vector<20x20xf32>
    %cst_5 = arith.constant dense<0.000000e+00> : vector<20xf32>
    %22 = vector.multi_reduction <add>, %21, %cst_5 [1] : vector<20x20xf32> to vector<20xf32>
    %23 = vector.shape_cast %22 : vector<20xf32> to vector<20x1xf32>
    %cst_6 = arith.constant 0.000000e+00 : f32
    %24 = vector.broadcast %cst_6 : f32 to vector<20x1xf32>
    %25 = arith.cmpf ogt, %23, %24 : vector<20x1xf32>
    %26 = math.rsqrt %23 : vector<20x1xf32>
    %cst_7 = arith.constant 0.000000e+00 : f32
    %27 = vector.broadcast %cst_7 : f32 to vector<20x1xf32>
    %28 = arith.select %25, %26, %27 : vector<20x1xi1>, vector<20x1xf32>
    %29 = vector.broadcast %28 : vector<20x1xf32> to vector<20x20xf32>
    %30 = arith.mulf %20, %29 : vector<20x20xf32>
    %cst_8 = arith.constant dense<0.000000e+00> : vector<20xf32>
    %31 = vector.multi_reduction <add>, %30, %cst_8 [0] : vector<20x20xf32> to vector<20xf32>
    %32 = vector.shape_cast %31 : vector<20xf32> to vector<1x20xf32>
    %33 = vector.broadcast %28 : vector<20x1xf32> to vector<20x20xf32>
    %34 = arith.mulf %21, %33 : vector<20x20xf32>
    %35 = vector.broadcast %32 : vector<1x20xf32> to vector<20x20xf32>
    %36 = arith.mulf %34, %35 : vector<20x20xf32>
    %37 = tpu.iota {dimensions = array<i32: 1>} : vector<1x8xi32>
    %c0_i32 = arith.constant 0 : i32
    %38 = vector.broadcast %c0_i32 : i32 to vector<1x8xi32>
    %39 = arith.cmpi eq, %37, %38 : vector<1x8xi32>
    %40 = arith.extui %39 : vector<1x8xi1> to vector<1x8xi32>
    %41 = arith.sitofp %40 : vector<1x8xi32> to vector<1x8xf32>
    %c0_9 = arith.constant 0 : index
    %c0_10 = arith.constant 0 : index
    %c0_11 = arith.constant 0 : index
    %42 = vector.load %arg2[%c0_9, %c0_10, %c0_11] : memref<1x20x8xf32, #tpu.memory_space<vmem>>, vector<1x20x8xf32>
    %43 = vector.shape_cast %42 : vector<1x20x8xf32> to vector<20x8xf32>
    %cst_12 = arith.constant dense<0.000000e+00> : vector<1x20xf32>
    %44 = tpu.matmul %41, %43, %cst_12 {dimension_numbers = #tpu.dot_dimension_numbers<[1], [1], [0], [0], [0, 0, 1, 0], [], []>} : vector<1x8xf32>, vector<20x8xf32>, vector<1x20xf32> -> vector<1x20xf32>
    %cst_13 = arith.constant 1.000000e+00 : f32
    %45 = vector.broadcast %cst_13 : f32 to vector<1x20xf32>
    %46 = arith.cmpf oeq, %44, %45 : vector<1x20xf32>
    %47 = arith.extui %46 : vector<1x20xi1> to vector<1x20xi32>
    %48 = arith.sitofp %47 : vector<1x20xi32> to vector<1x20xf32>
    %49 = arith.cmpi slt, %16, %17 : vector<20x20xi32>
    %50 = arith.extui %49 : vector<20x20xi1> to vector<20x20xi32>
    %51 = arith.sitofp %50 : vector<20x20xi32> to vector<20x20xf32>
    %cst_14 = arith.constant dense<0.000000e+00> : vector<1x20xf32>
    %52 = tpu.matmul %48, %51, %cst_14 {dimension_numbers = #tpu.dot_dimension_numbers<[1], [0], [0], [1], [0, 0, 1, 1], [], []>} : vector<1x20xf32>, vector<20x20xf32>, vector<1x20xf32> -> vector<1x20xf32>
    %53 = tpu.iota {dimensions = array<i32: 0>} : vector<13x20xi32>
    %54 = arith.sitofp %53 : vector<13x20xi32> to vector<13x20xf32>
    %55 = vector.broadcast %52 : vector<1x20xf32> to vector<13x20xf32>
    %56 = arith.cmpf oeq, %55, %54 : vector<13x20xf32>
    %57 = vector.broadcast %46 : vector<1x20xi1> to vector<13x20xi1>
    %58 = arith.andi %56, %57 : vector<13x20xi1>
    %59 = arith.extui %58 : vector<13x20xi1> to vector<13x20xi32>
    %60 = arith.sitofp %59 : vector<13x20xi32> to vector<13x20xf32>
    %c0_15 = arith.constant 0 : index
    %c0_16 = arith.constant 0 : index
    %c0_17 = arith.constant 0 : index
    %61 = vector.load %arg2[%c0_15, %c0_16, %c0_17] : memref<1x20x8xf32, #tpu.memory_space<vmem>>, vector<1x20x8xf32>
    %62 = vector.shape_cast %61 : vector<1x20x8xf32> to vector<20x8xf32>
    %cst_18 = arith.constant dense<0.000000e+00> : vector<20x8xf32>
    %63 = tpu.matmul %36, %62, %cst_18 {dimension_numbers = #tpu.dot_dimension_numbers<[1], [0], [0], [1], [0, 0, 1, 1], [], []>} : vector<20x20xf32>, vector<20x8xf32>, vector<20x8xf32> -> vector<20x8xf32>
    %c0_19 = arith.constant 0 : index
    %c0_20 = arith.constant 0 : index
    %64 = vector.load %arg3[%c0_19, %c0_20] : memref<8x256xf32, #tpu.memory_space<vmem>>, vector<8x256xf32>
    %cst_21 = arith.constant dense<0.000000e+00> : vector<20x256xf32>
    %65 = tpu.matmul %63, %64, %cst_21 {dimension_numbers = #tpu.dot_dimension_numbers<[1], [0], [0], [1], [0, 0, 1, 1], [], []>} : vector<20x8xf32>, vector<8x256xf32>, vector<20x256xf32> -> vector<20x256xf32>
    %c0_22 = arith.constant 0 : index
    %c0_23 = arith.constant 0 : index
    %66 = vector.load %arg4[%c0_22, %c0_23] : memref<1x256xf32, #tpu.memory_space<vmem>>, vector<1x256xf32>
    %67 = vector.broadcast %66 : vector<1x256xf32> to vector<20x256xf32>
    %68 = arith.addf %65, %67 : vector<20x256xf32>
    %cst_24 = arith.constant 0.000000e+00 : f32
    %69 = vector.broadcast %cst_24 : f32 to vector<20x256xf32>
    %70 = arith.maximumf %68, %69 : vector<20x256xf32>
    %cst_25 = arith.constant dense<0.000000e+00> : vector<13x20xf32>
    %71 = tpu.matmul %60, %36, %cst_25 {dimension_numbers = #tpu.dot_dimension_numbers<[1], [0], [0], [1], [0, 0, 1, 1], [], []>} : vector<13x20xf32>, vector<20x20xf32>, vector<13x20xf32> -> vector<13x20xf32>
    %cst_26 = arith.constant dense<0.000000e+00> : vector<13x256xf32>
    %72 = tpu.matmul %71, %70, %cst_26 {dimension_numbers = #tpu.dot_dimension_numbers<[1], [0], [0], [1], [0, 0, 1, 1], [], []>} : vector<13x20xf32>, vector<20x256xf32>, vector<13x256xf32> -> vector<13x256xf32>
    %c0_27 = arith.constant 0 : index
    %c0_28 = arith.constant 0 : index
    %73 = vector.load %arg5[%c0_27, %c0_28] : memref<256x64xf32, #tpu.memory_space<vmem>>, vector<256x64xf32>
    %cst_29 = arith.constant dense<0.000000e+00> : vector<13x64xf32>
    %74 = tpu.matmul %72, %73, %cst_29 {dimension_numbers = #tpu.dot_dimension_numbers<[1], [0], [0], [1], [0, 0, 1, 1], [], []>} : vector<13x256xf32>, vector<256x64xf32>, vector<13x64xf32> -> vector<13x64xf32>
    %c0_30 = arith.constant 0 : index
    %c0_31 = arith.constant 0 : index
    %75 = vector.load %arg6[%c0_30, %c0_31] : memref<1x64xf32, #tpu.memory_space<vmem>>, vector<1x64xf32>
    %76 = vector.broadcast %75 : vector<1x64xf32> to vector<13x64xf32>
    %77 = arith.addf %74, %76 : vector<13x64xf32>
    %cst_32 = arith.constant 0.000000e+00 : f32
    %78 = vector.broadcast %cst_32 : f32 to vector<13x64xf32>
    %79 = arith.maximumf %77, %78 : vector<13x64xf32>
    %80 = vector.extract_strided_slice %79 {offsets = [0, 0], sizes = [1, 64], strides = [1, 1]} : vector<13x64xf32> to vector<1x64xf32>
    %c0_33 = arith.constant 0 : index
    %c0_34 = arith.constant 0 : index
    %81 = vector.load %arg10[%c0_33, %c0_34] : memref<1x832xf32, #tpu.memory_space<vmem>>, vector<1x64xf32>
    tpu.vector_store %arg10[%c0_33, %c0_34], %80 {strides = array<i32>} : memref<1x832xf32, #tpu.memory_space<vmem>>, vector<1x64xf32>,
    %82 = vector.extract_strided_slice %79 {offsets = [1, 0], sizes = [1, 64], strides = [1, 1]} : vector<13x64xf32> to vector<1x64xf32>
    %c0_35 = arith.constant 0 : index
    %c64 = arith.constant 64 : index
    %83 = vector.load %arg10[%c0_35, %c64] : memref<1x832xf32, #tpu.memory_space<vmem>>, vector<1x64xf32>
    tpu.vector_store %arg10[%c0_35, %c64], %82 {strides = array<i32>} : memref<1x832xf32, #tpu.memory_space<vmem>>, vector<1x64xf32>,
    %84 = vector.extract_strided_slice %79 {offsets = [2, 0], sizes = [1, 64], strides = [1, 1]} : vector<13x64xf32> to vector<1x64xf32>
    %c0_36 = arith.constant 0 : index
    %c128 = arith.constant 128 : index
    %85 = vector.load %arg10[%c0_36, %c128] : memref<1x832xf32, #tpu.memory_space<vmem>>, vector<1x64xf32>
    tpu.vector_store %arg10[%c0_36, %c128], %84 {strides = array<i32>} : memref<1x832xf32, #tpu.memory_space<vmem>>, vector<1x64xf32>,
    %86 = vector.extract_strided_slice %79 {offsets = [3, 0], sizes = [1, 64], strides = [1, 1]} : vector<13x64xf32> to vector<1x64xf32>
    %c0_37 = arith.constant 0 : index
    %c192 = arith.constant 192 : index
    %87 = vector.load %arg10[%c0_37, %c192] : memref<1x832xf32, #tpu.memory_space<vmem>>, vector<1x64xf32>
    tpu.vector_store %arg10[%c0_37, %c192], %86 {strides = array<i32>} : memref<1x832xf32, #tpu.memory_space<vmem>>, vector<1x64xf32>,
    %88 = vector.extract_strided_slice %79 {offsets = [4, 0], sizes = [1, 64], strides = [1, 1]} : vector<13x64xf32> to vector<1x64xf32>
    %c0_38 = arith.constant 0 : index
    %c256 = arith.constant 256 : index
    %89 = vector.load %arg10[%c0_38, %c256] : memref<1x832xf32, #tpu.memory_space<vmem>>, vector<1x64xf32>
    tpu.vector_store %arg10[%c0_38, %c256], %88 {strides = array<i32>} : memref<1x832xf32, #tpu.memory_space<vmem>>, vector<1x64xf32>,
    %90 = vector.extract_strided_slice %79 {offsets = [5, 0], sizes = [1, 64], strides = [1, 1]} : vector<13x64xf32> to vector<1x64xf32>
    %c0_39 = arith.constant 0 : index
    %c320 = arith.constant 320 : index
    %91 = vector.load %arg10[%c0_39, %c320] : memref<1x832xf32, #tpu.memory_space<vmem>>, vector<1x64xf32>
    tpu.vector_store %arg10[%c0_39, %c320], %90 {strides = array<i32>} : memref<1x832xf32, #tpu.memory_space<vmem>>, vector<1x64xf32>,
    %92 = vector.extract_strided_slice %79 {offsets = [6, 0], sizes = [1, 64], strides = [1, 1]} : vector<13x64xf32> to vector<1x64xf32>
    %c0_40 = arith.constant 0 : index
    %c384 = arith.constant 384 : index
    %93 = vector.load %arg10[%c0_40, %c384] : memref<1x832xf32, #tpu.memory_space<vmem>>, vector<1x64xf32>
    tpu.vector_store %arg10[%c0_40, %c384], %92 {strides = array<i32>} : memref<1x832xf32, #tpu.memory_space<vmem>>, vector<1x64xf32>,
    %94 = vector.extract_strided_slice %79 {offsets = [7, 0], sizes = [1, 64], strides = [1, 1]} : vector<13x64xf32> to vector<1x64xf32>
    %c0_41 = arith.constant 0 : index
    %c448 = arith.constant 448 : index
    %95 = vector.load %arg10[%c0_41, %c448] : memref<1x832xf32, #tpu.memory_space<vmem>>, vector<1x64xf32>
    tpu.vector_store %arg10[%c0_41, %c448], %94 {strides = array<i32>} : memref<1x832xf32, #tpu.memory_space<vmem>>, vector<1x64xf32>,
    %96 = vector.extract_strided_slice %79 {offsets = [8, 0], sizes = [1, 64], strides = [1, 1]} : vector<13x64xf32> to vector<1x64xf32>
    %c0_42 = arith.constant 0 : index
    %c512 = arith.constant 512 : index
    %97 = vector.load %arg10[%c0_42, %c512] : memref<1x832xf32, #tpu.memory_space<vmem>>, vector<1x64xf32>
    tpu.vector_store %arg10[%c0_42, %c512], %96 {strides = array<i32>} : memref<1x832xf32, #tpu.memory_space<vmem>>, vector<1x64xf32>,
    %98 = vector.extract_strided_slice %79 {offsets = [9, 0], sizes = [1, 64], strides = [1, 1]} : vector<13x64xf32> to vector<1x64xf32>
    %c0_43 = arith.constant 0 : index
    %c576 = arith.constant 576 : index
    %99 = vector.load %arg10[%c0_43, %c576] : memref<1x832xf32, #tpu.memory_space<vmem>>, vector<1x64xf32>
    tpu.vector_store %arg10[%c0_43, %c576], %98 {strides = array<i32>} : memref<1x832xf32, #tpu.memory_space<vmem>>, vector<1x64xf32>,
    %100 = vector.extract_strided_slice %79 {offsets = [10, 0], sizes = [1, 64], strides = [1, 1]} : vector<13x64xf32> to vector<1x64xf32>
    %c0_44 = arith.constant 0 : index
    %c640 = arith.constant 640 : index
    %101 = vector.load %arg10[%c0_44, %c640] : memref<1x832xf32, #tpu.memory_space<vmem>>, vector<1x64xf32>
    tpu.vector_store %arg10[%c0_44, %c640], %100 {strides = array<i32>} : memref<1x832xf32, #tpu.memory_space<vmem>>, vector<1x64xf32>,
    %102 = vector.extract_strided_slice %79 {offsets = [11, 0], sizes = [1, 64], strides = [1, 1]} : vector<13x64xf32> to vector<1x64xf32>
    %c0_45 = arith.constant 0 : index
    %c704 = arith.constant 704 : index
    %103 = vector.load %arg10[%c0_45, %c704] : memref<1x832xf32, #tpu.memory_space<vmem>>, vector<1x64xf32>
    tpu.vector_store %arg10[%c0_45, %c704], %102 {strides = array<i32>} : memref<1x832xf32, #tpu.memory_space<vmem>>, vector<1x64xf32>,
    %104 = vector.extract_strided_slice %79 {offsets = [12, 0], sizes = [1, 64], strides = [1, 1]} : vector<13x64xf32> to vector<1x64xf32>
    %c0_46 = arith.constant 0 : index
    %c768 = arith.constant 768 : index
    %105 = vector.load %arg10[%c0_46, %c768] : memref<1x832xf32, #tpu.memory_space<vmem>>, vector<1x64xf32>
    tpu.vector_store %arg10[%c0_46, %c768], %104 {strides = array<i32>} : memref<1x832xf32, #tpu.memory_space<vmem>>, vector<1x64xf32>,
    %c0_47 = arith.constant 0 : index
    %c0_48 = arith.constant 0 : index
    %106 = vector.load %arg10[%c0_47, %c0_48] : memref<1x832xf32, #tpu.memory_space<vmem>>, vector<1x832xf32>
    %c0_49 = arith.constant 0 : index
    %c0_50 = arith.constant 0 : index
    %107 = vector.load %arg7[%c0_49, %c0_50] : memref<832x146xf32, #tpu.memory_space<vmem>>, vector<832x146xf32>
    %cst_51 = arith.constant dense<0.000000e+00> : vector<1x146xf32>
    %108 = tpu.matmul %106, %107, %cst_51 {dimension_numbers = #tpu.dot_dimension_numbers<[1], [0], [0], [1], [0, 0, 1, 1], [], []>} : vector<1x832xf32>, vector<832x146xf32>, vector<1x146xf32> -> vector<1x146xf32>
    %c0_52 = arith.constant 0 : index
    %c0_53 = arith.constant 0 : index
    %109 = vector.load %arg8[%c0_52, %c0_53] : memref<1x146xf32, #tpu.memory_space<vmem>>, vector<1x146xf32>
    %110 = arith.addf %108, %109 : vector<1x146xf32>
    %111 = tpu.iota {dimensions = array<i32: 1>} : vector<1x146xi32>
    %c1_i32 = arith.constant 1 : i32
    %112 = vector.broadcast %c1_i32 : i32 to vector<1x146xi32>
    %113 = arith.cmpi sge, %111, %112 : vector<1x146xi32>
    %cst_54 = arith.constant -1.000000e+30 : f32
    %114 = vector.broadcast %cst_54 : f32 to vector<1x146xf32>
    %115 = arith.select %113, %110, %114 : vector<1x146xi1>, vector<1x146xf32>
    %cst_55 = arith.constant dense<0xFF800000> : vector<1xf32>
    %116 = vector.multi_reduction <maximumf>, %115, %cst_55 [1] : vector<1x146xf32> to vector<1xf32>
    %117 = vector.shape_cast %116 : vector<1xf32> to vector<1x1xf32>
    %118 = vector.broadcast %117 : vector<1x1xf32> to vector<1x146xf32>
    %119 = arith.subf %115, %118 : vector<1x146xf32>
    %120 = math.exp %119 : vector<1x146xf32>
    %cst_56 = arith.constant 0.000000e+00 : f32
    %121 = vector.broadcast %cst_56 : f32 to vector<1x146xf32>
    %122 = arith.select %113, %120, %121 : vector<1x146xi1>, vector<1x146xf32>
    %cst_57 = arith.constant dense<0.000000e+00> : vector<1xf32>
    %123 = vector.multi_reduction <add>, %122, %cst_57 [1] : vector<1x146xf32> to vector<1xf32>
    %124 = vector.shape_cast %123 : vector<1xf32> to vector<1x1xf32>
    %125 = vector.broadcast %124 : vector<1x1xf32> to vector<1x146xf32>
    %126 = arith.divf %122, %125 : vector<1x146xf32>
    %c0_i32_58 = arith.constant 0 : i32
    %127 = vector.broadcast %c0_i32_58 : i32 to vector<1x146xi32>
    %128 = arith.cmpi eq, %111, %127 : vector<1x146xi32>
    %129 = arith.select %128, %110, %126 : vector<1x146xi1>, vector<1x146xf32>
    %c0_59 = arith.constant 0 : index
    %c0_60 = arith.constant 0 : index
    %c0_61 = arith.constant 0 : index
    %130 = vector.load %arg9[%c0_59, %c0_60, %c0_61] : memref<1x1x146xf32, #tpu.memory_space<vmem>>, vector<1x1x146xf32>
    %131 = vector.shape_cast %130 : vector<1x1x146xf32> to vector<1x146xf32>
    %132 = vector.shape_cast %129 : vector<1x146xf32> to vector<1x1x146xf32>
    tpu.vector_store %arg9[%c0_59, %c0_60, %c0_61], %132 {strides = array<i32>} : memref<1x1x146xf32, #tpu.memory_space<vmem>>, vector<1x1x146xf32>,
    return
  }
  func.func @transform_0(%arg0: i32) -> (i32, i32, i32) {
    %c0_i32 = arith.constant 0 : i32
    %c0_i32_0 = arith.constant 0 : i32
    %c0_i32_1 = arith.constant 0 : i32
    return %arg0, %c0_i32, %c0_i32_0 : i32, i32, i32
  }
  func.func @transform_1(%arg0: i32) -> (i32, i32, i32) {
    %c0_i32 = arith.constant 0 : i32
    %c0_i32_0 = arith.constant 0 : i32
    %c0_i32_1 = arith.constant 0 : i32
    return %arg0, %c0_i32, %c0_i32_0 : i32, i32, i32
  }
  func.func @transform_2(%arg0: i32) -> (i32, i32) {
    %c0_i32 = arith.constant 0 : i32
    %c0_i32_0 = arith.constant 0 : i32
    %c0_i32_1 = arith.constant 0 : i32
    return %c0_i32, %c0_i32_0 : i32, i32
  }
  func.func @transform_3(%arg0: i32) -> (i32, i32) {
    %c0_i32 = arith.constant 0 : i32
    %c0_i32_0 = arith.constant 0 : i32
    %c0_i32_1 = arith.constant 0 : i32
    return %c0_i32, %c0_i32_0 : i32, i32
  }
  func.func @transform_4(%arg0: i32) -> (i32, i32) {
    %c0_i32 = arith.constant 0 : i32
    %c0_i32_0 = arith.constant 0 : i32
    %c0_i32_1 = arith.constant 0 : i32
    return %c0_i32, %c0_i32_0 : i32, i32
  }
  func.func @transform_5(%arg0: i32) -> (i32, i32) {
    %c0_i32 = arith.constant 0 : i32
    %c0_i32_0 = arith.constant 0 : i32
    %c0_i32_1 = arith.constant 0 : i32
    return %c0_i32, %c0_i32_0 : i32, i32
  }
  func.func @transform_6(%arg0: i32) -> (i32, i32) {
    %c0_i32 = arith.constant 0 : i32
    %c0_i32_0 = arith.constant 0 : i32
    %c0_i32_1 = arith.constant 0 : i32
    return %c0_i32, %c0_i32_0 : i32, i32
  }
  func.func @transform_7(%arg0: i32) -> (i32, i32) {
    %c0_i32 = arith.constant 0 : i32
    %c0_i32_0 = arith.constant 0 : i32
    %c0_i32_1 = arith.constant 0 : i32
    return %c0_i32, %c0_i32_0 : i32, i32
  }
  func.func @transform_8(%arg0: i32) -> (i32, i32, i32) {
    %c0_i32 = arith.constant 0 : i32
    %c0_i32_0 = arith.constant 0 : i32
    %c0_i32_1 = arith.constant 0 : i32
    return %arg0, %c0_i32, %c0_i32_0 : i32, i32, i32
  }
}

</mosaic_0001>

<bundles_post_ra>
// kernel: actor_critic_forward.1
= control target key start
LH: loop header
LB: loop body
LE: loop exit
PB: predicated region body
PF: predicated region fallthrough
CT: control target
= control target key end

     0   :  { %s2526_s27 = smov 0   ;;  %s3517_s0 = inlined_call_operand.vmem [shape: s32[4,2,25], index: 0, kind: input, shape index: {}]   ;;  %s3518_s1 = inlined_call_operand.vmem [shape: f32[4,20,8], index: 1, kind: input, shape index: {}]   ;;  %s3519_s2 = inlined_call_operand.vmem [shape: f32[8,256], index: 2, kind: input, shape index: {}]   ;;  %s3520_s3 = inlined_call_operand.vmem [shape: f32[1,256], index: 3, kind: input, shape index: {}]   ;;  %s3521_s4 = inlined_call_operand.vmem [shape: f32[256,64], index: 4, kind: input, shape index: {}]   ;;  %s3522_s5 = inlined_call_operand.vmem [shape: f32[1,64], index: 5, kind: input, shape index: {}]   ;;  %s3523_s6 = inlined_call_operand.vmem [shape: f32[832,146], index: 6, kind: input, shape index: {}]   ;;  %s3524_s7 = inlined_call_operand.vmem [shape: f32[1,146], index: 7, kind: input, shape index: {}]   ;;  %s3525_s8 = inlined_call_operand.vmem [shape: f32[4,1,146], index: 8, kind: output, shape index: {}]  }
   0x1 LB: > { %s1990_s28 = sadd.s32 4294967295, %s2472_s27   ;;  %p1994_p0 = scmp.ge.s32.totalorder %s2472_s27, 1  ;;  %s2472_s27 = sphi %s2526_s27, %s18_s27  }
   0x2   : > { %p271_p1 = scmp.lt.s32.totalorder %s2472_s27, 5 }
   0x4   : > { %p272_p2 = pnand %p1994_p0, %p271_p1 }
   0x5   : > { %p308_p3 = scmp.lt.s32.totalorder (!%p272_p2), %s1990_s28, 3  ;;  %v321_v0 = vlaneseq (!%p272_p2)  ;;  %v2474_v1 = vmov (!%p272_p2), 0.0|0.0   ;;  %vm2475_vm0 = vmmov (!%p272_p2), 0   ;;  %v2476_v3 = vmov (!%p272_p2), 0.0   ;;  %v798_v44 = vld [vmem:[%s3519_s2 + $0x8] sm:$0xff] (!%p272_p2)  ;;  %v797_v45 = vld [vmem:[%s3519_s2] sm:$0xff] (!%p272_p2) }
   0x6   : > { %275 = sbr.rel (%p272_p2) target bundleno = 2070 (0x816), region = 52  ;;  %2168 = vmatprep.subr.bf16.mxu1 (!%p272_p2), %v2474_v1  ;;  %2179 = vmatprep.subr.bf16.mxu0 (!%p272_p2), %v2474_v1  ;;  %vm353_vm1 = vcmask (!%p272_p2), 203776   ;;  %vm515_vm7 = vcmask (!%p272_p2), 64512   ;;  %v2477_v21 = vmov (!%p272_p2), 1.0|1.0   ;;  %s2480_s13 = smov (!%p272_p2), 64  }
   0x7   : > { %v2537_v2 = vshrl.u32 (!%p272_p2), %v321_v0, 7  ;;  %2117 = vmatprep.mubr.msk.f32.mxu1 (!%p272_p2), %vm2475_vm0, %v2476_v3  ;;  %2150 = vmatprep.mubr.msk.f32.mxu0 (!%p272_p2), %vm2475_vm0, %v2476_v3  ;;  %vm2170_vm4 = vmpackc.low (!%p272_p2), %vm353_vm1, %vm353_vm1  ;;  %v2586_v17 = vand.u32 (!%p272_p2), 127, %v321_v0 }
   0x8   : > { %vm2174_vm8 = vmpackc.low (!%p272_p2), %vm515_vm7, %vm515_vm7 }
   0x9   : > { %v2546_v4 = vadd.s32 (!%p272_p2), 8, %v2537_v2  ;;  %v2567_v11 = vadd.s32 (!%p272_p2), 16, %v2537_v2  ;;  %vm509_vm11 = vcmp.eq.s32.totalorder (!%p272_p2), %v2586_v17, 0  ;;  %vm601_vm12 = vcmp.lt.s32.totalorder (!%p272_p2), %v2537_v2, %v2586_v17 }
   0xa   : > { %v2015_v20 = vsel (!%p272_p2), %vm509_vm11, 1.0, %v2476_v3 }
   0xb   : > { %vm602_vm13 = vcmp.lt.s32.totalorder (!%p272_p2), %v2546_v4, %v2586_v17  ;;  %vm603_vm15 = vcmp.lt.s32.totalorder (!%p272_p2), %v2567_v11, %v2586_v17 }
   0xc   : > { %vm2177_vm14 = vmpackc.low (!%p272_p2), %vm602_vm13, %vm601_vm12  ;;  %v2023_v22 = vsel (!%p272_p2), %vm603_vm15, 1.0, %v2476_v3 }
   0xd   : > { %s3535_s28 = smov (!%p308_p3, %s1990_s28), 3 }
   0xe   : > { %s1995_s29 = sshll.u32 %s3535_s28, 1  ;;  %s2438_s30 = smul.u32 24, %s3535_s28 }
   0xf   : > { %s311_s11 = scalar_lea.vmem %s3517_s0, %s1995_s29  ;;  %s320_s15 = scalar_lea.vmem %s3525_s8, %s1995_s29 }
  0x10   : > { %s2556_s14 = scalar_lea.vmem %s3518_s1, %s2438_s30  ;;  %v1998_v5 = vld [vmem:[%s311_s11] ss:$0 sm:$0xff]  ;;  %v2002_v13 = vld [vmem:[%s311_s11 + $0x1] ss:$0 sm:$0xff] }
  0x11   : > { %vm330_vm2 = vcmp.eq.s32.totalorder %v2537_v2, %v1998_v5  ;;  %vm331_vm3 = vcmp.eq.s32.totalorder %v2546_v4, %v1998_v5  ;;  %v512_v6 = vld [vmem:[%s2556_s14] sm:$0xff]  ;;  %v513_v7 = vld [vmem:[%s2556_s14 + $0x8] sm:$0xff]  ;;  %vm332_vm5 = vcmp.eq.s32.totalorder %v2567_v11, %v1998_v5  ;;  %vm344_vm6 = vcmp.eq.s32.totalorder %v2537_v2, %v2002_v13  ;;  %v514_v19 = vld [vmem:[%s2556_s14 + $0x10] sm:$0xf] }
  0x12   : > { %v1999_v8 = vsel %vm330_vm2, 1.0, %v2476_v3  ;;  %v2000_v9 = vsel %vm331_vm3, 1.0, %v2476_v3  ;;  %v2173_v12 = vpack.c.bf16 %v513_v7, %v512_v6  ;;  %v2001_v14 = vsel %vm332_vm5, 1.0, %v2476_v3 }
  0x13   : > { %v2169_v10 = vpack.c.bf16 %v2000_v9, %v1999_v8  ;;  %v2003_v15 = vsel %vm344_vm6, 1.0, %v2476_v3  ;;  %vm345_vm9 = vcmp.eq.s32.totalorder %v2546_v4, %v2002_v13  ;;  %vm346_vm10 = vcmp.eq.s32.totalorder %v2567_v11, %v2002_v13 }
  0x14   : > { %2181 = vmatpush3.bf16.msra.mxu0 %v2173_v12  ;;  %v2004_v16 = vsel %vm345_vm9, 1.0, %v2476_v3  ;;  %v2005_v18 = vsel %vm346_vm10, 1.0, %v2476_v3  ;;  %vm457_vm2 = vcmp.eq.s32.totalorder %v2537_v2, %v2586_v17  ;;  %vm458_vm3 = vcmp.eq.s32.totalorder %v2546_v4, %v2586_v17 }
  0x15   : > { %2171 = vmatpush3.bf16.xpose.msk.msra.mxu1 %vm2170_vm4, %v2169_v10  ;;  %2148 = vmatprep.subr.mxu0 %v2476_v3  ;;  %v2012_v24 = vsel %vm457_vm2, 1.0, %v2476_v3  ;;  %vm469_vm4 = vcmask 162816   ;;  %v2013_v29 = vsel %vm458_vm3, 1.0, %v2476_v3  ;;  %vm459_vm5 = vcmp.eq.s32.totalorder %v2567_v11, %v2586_v17 }
  0x16   : > { %2115 = vmatprep.subr.mxu1 %v2476_v3  ;;  %v2014_v35 = vsel %vm459_vm5, 1.0, %v2476_v3  ;;  %vm476_vm6 = vcmask 158720   ;;  %vm1229_vm3 = vcmp.lt.s32.totalorder %v321_v0, 128  ;;  %vm1586_vm5 = vcmask 523264  }
  0x1d   : > { %2116 = vmatpush3.xpose.msk.msra.mxu1 %vm353_vm1, %v2001_v14 }
  0x1e   : > { %2172 = vmatprep.subr.bf16.mxu1 %v2474_v1 }
  0x20   : > { %2118 = vmatmul.mubr.msk.f32.vlgmr.msra.gmra.mrb[0].mxu1 %vm353_vm1, %v2003_v15 }
  0x21   : > { %2175 = vmatpush3.bf16.xpose.msk.msra.mxu1 %vm2174_vm8, %v2173_v12  ;;  %2120 = vmatprep.mubr.msk.f32.mxu1 %vm2475_vm0, %v2476_v3 }
  0x22   : > { %2130 = vmatprep.subr.mxu1 %v2476_v3 }
  0x24   : > { %2121 = vmatmul.mubr.msk.f32.gmra.mrb[2].mxu1 %vm353_vm1, %v2004_v16  ;;  %v2647_v16 = vsub.s32 0, %v2537_v2 }
  0x25   : > { %2123 = vmatprep.mubr.msk.f32.mxu1 %vm2475_vm0, %v2476_v3 }
  0x28   : > { %2124 = vmatmul.mubr.msk.f32.gmra.mrb[4].mxu1 %vm353_vm1, %v2005_v18  ;;  %vm613_vm1 = vcmask 1043456   ;;  %v2478_v18 = vmov 0  }
  0x29   : > { %2131 = vmatpush3.xpose.msk.msra.mxu1 %vm515_vm7, %v514_v19  ;;  %2132 = vmatprep.mubr.msk.f32.mxu1 %vm2475_vm0, %v2476_v3 }
  0x2a   : > { %2176 = vmatprep.subr.bf16.mxu1 %v2474_v1  ;;  %2149 = vmatpush3.msk.msra.mxu0 %vm613_vm1, %v514_v19 }
  0x2c   : > { %2133 = vmatmul.mubr.msk.f32.vlgmr.msra.gmra.mrb[6].mxu1 %vm515_vm7, %v2015_v20 }
  0x2d   : > { %2141 = vmatprep.mubr.msk.f32.mxu1 %vm2475_vm0, %v2476_v3  ;;  %2178 = vmatpush3.bf16.msk.msra.mxu1 %vm2177_vm14, %v2477_v21  ;;  %v687_v21 = vcvt.s32.f32 %v2537_v2 }
  0x2e   : > { %2139 = vmatprep.subr.mxu1 %v2476_v3 }
  0x31   : > { %2140 = vmatpush3.msk.msra.mxu1 %vm613_vm1, %v2023_v22  ;;  %v688_v22 = vcvt.s32.f32 %v2546_v4 }
  0x32   : > { %820 = vmatprep.subr.mxu1 %v798_v44 }
  0xf3   : > { %v438_v23 = vpop.f32.mrb[0].mxu1 }
  0xf4   : > { %v452_v25 = vmin.f32 %v438_v23, 1.0  ;;  %v2119_v26 = vpop.f32.mrb[1].mxu1 }
  0xf5   : > { %v1088_v26 = vld [vmem:[%s3521_s4 + $0x38] sm:$0xff] }
  0xf6   : > { %v466_v27 = vadd.f32 %v2012_v24, %v452_v25 }
  0xf7   : > { %v443_v28 = vpop.f32.mrb[2].mxu1 }
  0xf8   : > { %v453_v30 = vmin.f32 %v443_v28, 1.0  ;;  %v2122_v31 = vpop.f32.mrb[3].mxu1  ;;  %v470_v32 = vsel %vm469_vm4, %v466_v27, 0.0  ;;  %v1106_v28 = vld [vmem:[%s3521_s4 + $0xc8] sm:$0xff] }
  0xf9   : > { %471 = vadd.xlane.f32.xlu0 %v470_v32 }
  0xfa   : > { %v467_v33 = vadd.f32 %v2013_v29, %v453_v30 }
  0xfb   : > { %v448_v34 = vpop.f32.mrb[4].mxu1 }
  0xfc   : > { %v454_v36 = vmin.f32 %v448_v34, 1.0  ;;  %v2125_v37 = vpop.f32.mrb[5].mxu1  ;;  %v473_v38 = vsel %vm469_vm4, %v467_v33, 0.0 }
  0xfd   : > { %474 = vadd.xlane.f32.xlu0 %v473_v38  ;;  %v2700_v37 = vsub.s32 1, %v2537_v2 }
  0xfe   : > { %v468_v39 = vadd.f32 %v2014_v35, %v454_v36  ;;  %v799_v36 = vld [vmem:[%s3520_s3] sm:$0x3] }
  0xff   : > { %v594_v40 = vpop.f32.mrb[6].mxu1  ;;  %v804_v38 = vrot.slane %v799_v36, %v2647_v16 }
 0x100   : > { %vm598_vm8 = vcmp.eq.f32.partialorder %v594_v40, 1.0  ;;  %v477_v41 = vsel %vm476_vm6, %v468_v39, 0.0  ;;  %v2134_v42 = vpop.f32.mrb[7].mxu1  ;;  %v808_v40 = vrot.slane %v799_v36, %v2700_v37  ;;  %v1091_v36 = vld [vmem:[%s3521_s4 + $0x50] sm:$0xff] }
 0x101   : > { %v2020_v43 = vsel %vm598_vm8, 1.0, %v2476_v3  ;;  %478 = vadd.xlane.f32.xlu1 %v477_v41  ;;  %v599_v19 = vsel %vm598_vm8, 1, %v2478_v18  ;;  %vm1878_vm8 = vcmask 1040384  }
 0x102   : > { %2142 = vmatmul.mubr.msk.f32.vlgmr.msra.gmra.mrb[8].mxu1 %vm469_vm4, %v2020_v43  ;;  %v698_v20 = vrot.slane %v599_v19, %v2647_v16  ;;  %v1085_v19 = vld [vmem:[%s3521_s4 + $0x20] sm:$0xff] }
 0x103   : > { %884 = vmatprep.mubr.f32.mxu1 %v2476_v3  ;;  %821 = vmatpush1.msra.mxu1 %v797_v45 }
 0x186   : > { %v472_v46 = vpop.xlane.xlu0 %471 }
 0x187   : > { %2454 = vrsqrt.f32 %v472_v46  ;;  %vm480_vm9 = vcmp.gt.f32.partialorder %v472_v46, 0.0 }
 0x18a   : > { %v475_v47 = vpop.xlane.xlu0 %474 }
 0x18b   : > { %2456 = vrsqrt.f32 %v475_v47  ;;  %vm481_vm10 = vcmp.gt.f32.partialorder %v475_v47, 0.0 }
 0x18e   : > { %v479_v48 = vpop.xlane.xlu1 %478 }
 0x18f   : > { %2458 = vrsqrt.f32 %v479_v48  ;;  %vm482_vm12 = vcmp.gt.f32.partialorder %v479_v48, 0.0 }
 0x191   : > { %v2455_v49 = vpop.eup %2454 }
 0x192   : > { %v486_v50 = vsel %vm480_vm9, %v2455_v49, 0.0  ;;  %vm1880_vm9 = vcmask 139264  }
 0x193   : > { %v489_v53 = vmul.f32 %v2012_v24, %v486_v50  ;;  %v503_v8 = vmul.f32 %v486_v50, %v466_v27  ;;  %v1105_v27 = vld [vmem:[%s3521_s4 + $0xc0] sm:$0xff] }
 0x195   : > { %v2457_v51 = vpop.eup %2456  ;;  %v492_v58 = vsel %vm469_vm4, %v489_v53, 0.0 }
 0x196   : > { %v487_v52 = vsel %vm481_vm10, %v2457_v51, 0.0  ;;  %vm1922_vm10 = vcmp.lt.s32.totalorder %v321_v0, 146 }
 0x197   : > { %v490_v54 = vmul.f32 %v2013_v29, %v487_v52  ;;  %v504_v9 = vmul.f32 %v487_v52, %v467_v33 }
 0x199   : > { %v2459_v55 = vpop.eup %2458  ;;  %v493_v56 = vsel %vm469_vm4, %v490_v54, 0.0 }
 0x19a   : > { %v488_v57 = vsel %vm482_vm12, %v2459_v55, 0.0  ;;  %v494_v60 = vadd.f32 %v493_v56, %v492_v58  ;;  %v1097_v58 = vld [vmem:[%s3521_s4 + $0x80] sm:$0xff] }
 0x19b   : > { %v491_v59 = vmul.f32 %v2014_v35, %v488_v57  ;;  %v505_v14 = vmul.f32 %v488_v57, %v468_v39 }
 0x19d   : > { %v495_v61 = vsel %vm476_vm6, %v491_v59, 0.0  ;;  %v1098_v59 = vld [vmem:[%s3521_s4 + $0x88] sm:$0xff]  ;;  %vm1874_vm6 = vcmp.ge.s32.totalorder %v2586_v17, 1 }
 0x19e   : > { %v496_v62 = vadd.f32 %v495_v61, %v494_v60 }
 0x1a0   : > { %v497_v63 = vrot.slane %v496_v62, 4 }
 0x1a2   : > { %v498_v1 = vadd.f32 %v497_v63, %v496_v62  ;;  %v1081_v62 = vld [vmem:[%s3521_s4] sm:$0xff]  ;;  %v1082_v63 = vld [vmem:[%s3521_s4 + $0x8] sm:$0xff] }
 0x1a4   : > { %v499_v5 = vrot.slane %v498_v1, 2 }
 0x1a6   : > { %v500_v6 = vadd.f32 %v499_v5, %v498_v1  ;;  %v1099_v5 = vld [vmem:[%s3521_s4 + $0x90] sm:$0xff] }
 0x1a8   : > { %v501_v7 = vrot.slane %v500_v6, 1 }
 0x1aa   : > { %v502_v10 = vadd.f32 %v501_v7, %v500_v6  ;;  %v1100_v6 = vld [vmem:[%s3521_s4 + $0x98] sm:$0xff]  ;;  %v2190_v7 = vpack.c.bf16 %v1098_v59, %v1097_v58  ;;  %v1332_v58 = vld [vmem:[%s3523_s6 + $0x8] sm:$0xff] }
 0x1ac   : > { %v506_v11 = vmul.f32 %v503_v8, %v502_v10  ;;  %v507_v12 = vmul.f32 %v504_v9, %v502_v10  ;;  %v508_v15 = vmul.f32 %v505_v14, %v502_v10  ;;  %v2192_v9 = vpack.c.bf16 %v1082_v63, %v1081_v62  ;;  %v1102_v14 = vld [vmem:[%s3521_s4 + $0xa8] sm:$0xff]  ;;  %v1397_v62 = vld [vmem:[%s3523_s6 + $0x210] sm:$0xff] }
 0x1ad   : > { %v2194_v10 = vpack.c.bf16 %v1100_v6, %v1099_v5  ;;  %v1331_v5 = vld [vmem:[%s3523_s6] sm:$0xff]  ;;  %v1333_v6 = vld [vmem:[%s3523_s6 + $0x10] sm:$0xff] }
 0x1ae   : > { %2151 = vmatmul.mubr.msk.f32.vlgmr.msra.gmra.mrb[0].mxu0 %vm469_vm4, %v506_v11  ;;  %v2182_v13 = vpack.c.bf16 %v507_v12, %v506_v11  ;;  %v1083_v11 = vld [vmem:[%s3521_s4 + $0x10] sm:$0xff] }
 0x1af   : > { %2153 = vmatprep.mubr.msk.f32.mxu0 %vm2475_vm0, %v2476_v3 }
 0x1b0   : > { %2183 = vmatprep.subr.bf16.mxu1 %v2182_v13 }
 0x1b2   : > { %2154 = vmatmul.mubr.msk.f32.gmra.mrb[2].mxu0 %vm469_vm4, %v507_v12  ;;  %v1084_v12 = vld [vmem:[%s3521_s4 + $0x18] sm:$0xff] }
 0x1b3   : > { %2156 = vmatprep.mubr.msk.f32.mxu0 %vm2475_vm0, %v2476_v3  ;;  %vm2654_vm0 = vcmp.eq.s32.totalorder %v698_v20, 1  ;;  %v1086_v20 = vld [vmem:[%s3521_s4 + $0x28] sm:$0xff] }
 0x1b6   : > { %2157 = vmatmul.mubr.msk.f32.gmra.mrb[4].mxu0 %vm469_vm4, %v508_v15 }
 0x1d5   : > { %v683_v23 = vpop.f32.mrb[8].mxu1 }
 0x1d6   : > { %v692_v24 = vrot.slane %v683_v23, %v2647_v16  ;;  %v2143_v25 = vpop.f32.mrb[9].mxu1  ;;  %v2200_v23 = vpack.c.bf16 %v1086_v20, %v1085_v19  ;;  %v1337_v20 = vld [vmem:[%s3523_s6 + $0x30] sm:$0xff] }
 0x1d7   : > { %v1087_v25 = vld [vmem:[%s3521_s4 + $0x30] sm:$0xff] }
 0x1d8   : > { %vm2658_vm13 = vcmp.eq.f32.partialorder %v692_v24, %v687_v21  ;;  %vm2662_vm14 = vcmp.eq.f32.partialorder %v692_v24, %v688_v22  ;;  %v1103_v21 = vld [vmem:[%s3521_s4 + $0xb0] sm:$0xff]  ;;  %v1104_v22 = vld [vmem:[%s3521_s4 + $0xb8] sm:$0xff] }
 0x1d9   : > { %vm700_vm15 = vmand %vm2658_vm13, %vm2654_vm0  ;;  %v2202_v24 = vpack.c.bf16 %v1104_v22, %v1103_v21  ;;  %v1404_v21 = vld [vmem:[%s3523_s6 + $0x248] sm:$0xff]  ;;  %v1406_v22 = vld [vmem:[%s3523_s6 + $0x258] sm:$0xff] }
 0x1da   : > { %vm701_vm2 = vmand %vm2662_vm14, %vm2654_vm0  ;;  %v2028_v34 = vsel %vm700_vm15, 1.0, %v2476_v3 }
 0x1db   : > { %v2029_v35 = vsel %vm701_vm2, 1.0, %v2476_v3 }
 0x281   : > { %v783_v4 = vpop.f32.mrb[0].mxu0 }
 0x282   : > { %v2152_v29 = vpop.f32.mrb[1].mxu0  ;;  %2034 = vmatmul.mubr.msk.f32.vlgmr.msra.gmra.mrb[10].mxu1 %vm515_vm7, %v783_v4  ;;  %v2204_v4 = vpack.c.bf16 %v1088_v26, %v1087_v25  ;;  %v1340_v25 = vld [vmem:[%s3523_s6 + $0x48] sm:$0xff]  ;;  %v1342_v26 = vld [vmem:[%s3523_s6 + $0x58] sm:$0xff] }
 0x283   : > { %2185 = vmatpush3.bf16.msra.mxu1 %v2182_v13  ;;  %890 = vmatprep.mubr.f32.mxu1 %v2476_v3  ;;  %v1101_v13 = vld [vmem:[%s3521_s4 + $0xa0] sm:$0xff]  ;;  %v2206_v29 = vpack.c.bf16 %v1106_v28, %v1105_v27  ;;  %v2230_v28 = vpack.c.bf16 %v1342_v26, %v1340_v25  ;;  %v1362_v25 = vld [vmem:[%s3523_s6 + $0xf8] sm:$0xff] }
 0x284   : > { %2163 = vmatprep.subr.msk.mxu1 %vm613_vm1, %v508_v15  ;;  %v2198_v18 = vpack.c.bf16 %v1102_v14, %v1101_v13  ;;  %v1399_v14 = vld [vmem:[%s3523_s6 + $0x220] sm:$0xff] }
 0x285   : > { %v788_v30 = vpop.f32.mrb[2].mxu0  ;;  %v1403_v27 = vld [vmem:[%s3523_s6 + $0x240] sm:$0xff] }
 0x286   : > { %v2155_v31 = vpop.f32.mrb[3].mxu0  ;;  %2035 = vmatmul.mubr.msk.f32.gmra.mrb[12].mxu1 %vm515_vm7, %v788_v30  ;;  %v1089_v30 = vld [vmem:[%s3521_s4 + $0x40] sm:$0xff] }
 0x287   : > { %2164 = vmatpush3.msk.msra.mxu1 %vm613_vm1, %v508_v15  ;;  %896 = vmatprep.mubr.f32.mxu1 %v2476_v3  ;;  %v2196_v15 = vpack.c.bf16 %v1084_v12, %v1083_v11  ;;  %v1090_v31 = vld [vmem:[%s3521_s4 + $0x48] sm:$0xff]  ;;  %v1338_v11 = vld [vmem:[%s3523_s6 + $0x38] sm:$0xff] }
 0x289   : > { %v793_v32 = vpop.f32.mrb[4].mxu0 }
 0x28a   : > { %v2158_v33 = vpop.f32.mrb[5].mxu0  ;;  %2036 = vmatmul.mubr.msk.f32.gmra.mrb[14].mxu1 %vm515_vm7, %v793_v32  ;;  %v1107_v32 = vld [vmem:[%s3521_s4 + $0xd0] sm:$0xff]  ;;  %vm3100_vm7 = vcmp.lt.s32.totalorder %v321_v0, 64 }
 0x28b   : > { %2165 = vmatprep.mubr.msk.f32.mxu1 %vm469_vm4, %v2028_v34  ;;  %v1108_v33 = vld [vmem:[%s3521_s4 + $0xd8] sm:$0xff]  ;;  %v2208_v34 = vpack.c.bf16 %v1090_v31, %v1089_v30  ;;  %v1341_v30 = vld [vmem:[%s3523_s6 + $0x50] sm:$0xff] }
 0x28e   : > { %2166 = vmatmul.mubr.msk.f32.vlgmr.msra.gmra.mrb[16].mxu1 %vm469_vm4, %v2029_v35  ;;  %v2210_v35 = vpack.c.bf16 %v1108_v33, %v1107_v32  ;;  %v1408_v32 = vld [vmem:[%s3523_s6 + $0x268] sm:$0xff]  ;;  %v1410_v33 = vld [vmem:[%s3523_s6 + $0x278] sm:$0xff] }
 0x28f   : > { %1068 = vmatprep.mubr.f32.mxu1 %v2476_v3 }
 0x355   : > { %v886_v39 = vpop.f32.mrb[10].mxu1 }
 0x356   : > { %v888_v41 = vpop.f32.mrb[11].mxu1  ;;  %v887_v42 = vadd.f32 %v886_v39, %v804_v38  ;;  %v1109_v39 = vld [vmem:[%s3521_s4 + $0xe0] sm:$0xff] }
 0x357   : > { %v889_v43 = vadd.f32 %v888_v41, %v808_v40 }
 0x358   : > { %v903_v48 = vmax.f32 %v887_v42, 0.0 }
 0x359   : > { %v892_v44 = vpop.f32.mrb[12].mxu1  ;;  %v904_v50 = vmax.f32 %v889_v43, 0.0  ;;  %v1093_v43 = vld [vmem:[%s3521_s4 + $0x60] sm:$0xff] }
 0x35a   : > { %v893_v45 = vadd.f32 %v892_v44, %v804_v38  ;;  %v894_v46 = vpop.f32.mrb[13].mxu1  ;;  %v1094_v44 = vld [vmem:[%s3521_s4 + $0x68] sm:$0xff] }
 0x35b   : > { %v895_v47 = vadd.f32 %v894_v46, %v808_v40  ;;  %v1112_v46 = vld [vmem:[%s3521_s4 + $0xf8] sm:$0xff] }
 0x35c   : > { %v905_v49 = vmax.f32 %v893_v45, 0.0  ;;  %v1111_v45 = vld [vmem:[%s3521_s4 + $0xf0] sm:$0xff] }
 0x35d   : > { %v906_v51 = vmax.f32 %v895_v47, 0.0  ;;  %v898_v52 = vpop.f32.mrb[14].mxu1  ;;  %v2216_v47 = vpack.c.bf16 %v1094_v44, %v1093_v43  ;;  %v1345_v43 = vld [vmem:[%s3523_s6 + $0x70] sm:$0xff]  ;;  %v1412_v44 = vld [vmem:[%s3523_s6 + $0x288] sm:$0xff] }
 0x35e   : > { %v2188_v53 = vpack.c.bf16 %v905_v49, %v903_v48  ;;  %v900_v54 = vpop.f32.mrb[15].mxu1  ;;  %v899_v57 = vadd.f32 %v898_v52, %v804_v38  ;;  %v1092_v38 = vld [vmem:[%s3521_s4 + $0x58] sm:$0xff]  ;;  %v2218_v48 = vpack.c.bf16 %v1112_v46, %v1111_v45  ;;  %v1095_v49 = vld [vmem:[%s3521_s4 + $0x70] sm:$0xff]  ;;  %v1348_v46 = vld [vmem:[%s3523_s6 + $0x88] sm:$0xff] }
 0x35f   : > { %v2186_v55 = vpack.c.bf16 %v906_v51, %v904_v50  ;;  %v901_v56 = vadd.f32 %v900_v54, %v808_v40  ;;  %v1110_v40 = vld [vmem:[%s3521_s4 + $0xe8] sm:$0xff]  ;;  %v2212_v41 = vpack.c.bf16 %v1092_v38, %v1091_v36  ;;  %v1096_v50 = vld [vmem:[%s3521_s4 + $0x78] sm:$0xff]  ;;  %v2298_v36 = vpack.c.bf16 %v1410_v33, %v1408_v32  ;;  %v1361_v32 = vld [vmem:[%s3523_s6 + $0xf0] sm:$0xff] }
 0x360   : > { %v907_v8 = vmax.f32 %v899_v57, 0.0  ;;  %v2214_v42 = vpack.c.bf16 %v1110_v40, %v1109_v39  ;;  %v2220_v51 = vpack.c.bf16 %v1096_v50, %v1095_v49  ;;  %v1398_v57 = vld [vmem:[%s3523_s6 + $0x218] sm:$0xff]  ;;  %v1407_v39 = vld [vmem:[%s3523_s6 + $0x260] sm:$0xff]  ;;  %v1409_v40 = vld [vmem:[%s3523_s6 + $0x270] sm:$0xff] }
 0x361   : > { %v908_v60 = vmax.f32 %v901_v56, 0.0  ;;  %v2167_v61 = vpop.f32.mrb[16].mxu1  ;;  %2187 = vmatprep.subr.bf16.mxu1 %v2186_v55  ;;  %v1396_v56 = vld [vmem:[%s3523_s6 + $0x208] sm:$0xff]  ;;  %v1346_v38 = vld [vmem:[%s3523_s6 + $0x78] sm:$0xff] }
 0x362   : > { %v983_v1 = vpop.f32.mrb[17].mxu1  ;;  %2189 = vmatpush1.bf16.msra.mxu1 %v2188_v53  ;;  %v2286_v59 = vpack.c.bf16 %v1398_v57, %v1396_v56  ;;  %v1414_v45 = vld [vmem:[%s3523_s6 + $0x298] sm:$0xff]  ;;  %v1416_v56 = vld [vmem:[%s3523_s6 + $0x2a8] sm:$0xff] }
 0x363   : > { %2040 = vmatprep.subr.msk.mxu1 %vm613_vm1, %v908_v60  ;;  %v1334_v60 = vld [vmem:[%s3523_s6 + $0x18] sm:$0xff]  ;;  %v2302_v50 = vpack.c.bf16 %v1414_v45, %v1412_v44  ;;  %v1428_v33 = vld [vmem:[%s3523_s6 + $0x308] sm:$0xff]  ;;  %v1365_v45 = vld [vmem:[%s3523_s6 + $0x110] sm:$0xff] }
 0x364   : > { %v2222_v63 = vpack.c.bf16 %v1334_v60, %v1332_v58  ;;  %2287 = vmatprep.subr.bf16.mxu0 %v2286_v59  ;;  %v1418_v57 = vld [vmem:[%s3523_s6 + $0x2b8] sm:$0xff]  ;;  %v1352_v58 = vld [vmem:[%s3523_s6 + $0xa8] sm:$0xff] }
 0x365   : > { %v1354_v59 = vld [vmem:[%s3523_s6 + $0xb8] sm:$0xff] }
 0x366   : > { %2041 = vmatpush1.msk.msra.mxu1 %vm613_vm1, %v907_v8  ;;  %v2224_v8 = vpack.c.bf16 %v1333_v6, %v1331_v5  ;;  %v1351_v5 = vld [vmem:[%s3523_s6 + $0xa0] sm:$0xff]  ;;  %v2242_v6 = vpack.c.bf16 %v1354_v59, %v1352_v58  ;;  %v1436_v58 = vld [vmem:[%s3523_s6 + $0x348] sm:$0xff]  ;;  %v1438_v59 = vld [vmem:[%s3523_s6 + $0x358] sm:$0xff]  ;;  %vm1228_vm1 = vcmp.ge.s32.totalorder %v321_v0, 64 }
 0x367   : > { %2042 = vmatmul.mubr.msk.f32.vlgmr.msra.gmra.mrb[18].mxu1 %vm469_vm4, %v983_v1  ;;  %2191 = vmatprep.subr.bf16.mxu1 %v2190_v7  ;;  %v1400_v7 = vld [vmem:[%s3523_s6 + $0x228] sm:$0xff] }
 0x368   : > { %1074 = vmatprep.mubr.f32.mxu1 %v2476_v3  ;;  %2193 = vmatpush3.bf16.msra.mxu1 %v2192_v9  ;;  %v1402_v9 = vld [vmem:[%s3523_s6 + $0x238] sm:$0xff] }
 0x369   : > { %2195 = vmatprep.subr.bf16.mxu1 %v2194_v10  ;;  %v1336_v10 = vld [vmem:[%s3523_s6 + $0x28] sm:$0xff]  ;;  %v2290_v12 = vpack.c.bf16 %v1402_v9, %v1400_v7  ;;  %v1353_v7 = vld [vmem:[%s3523_s6 + $0xb0] sm:$0xff]  ;;  %v1422_v9 = vld [vmem:[%s3523_s6 + $0x2d8] sm:$0xff] }
 0x36a   : > { %v2226_v13 = vpack.c.bf16 %v1338_v11, %v1336_v10  ;;  %v1356_v10 = vld [vmem:[%s3523_s6 + $0xc8] sm:$0xff]  ;;  %v1358_v11 = vld [vmem:[%s3523_s6 + $0xd8] sm:$0xff] }
 0x36b   : > { %2043 = vmatmul.mubr.msk.f32.gmra.mrb[20].mxu1 %vm469_vm4, %v2167_v61  ;;  %v1395_v61 = vld [vmem:[%s3523_s6 + $0x200] sm:$0xff]  ;;  %vm1230_vm4 = vmand %vm1228_vm1, %vm1229_vm3 }
 0x36c   : > { %2197 = vmatpush3.bf16.msra.mxu1 %v2196_v15  ;;  %v2288_v1 = vpack.c.bf16 %v1397_v62, %v1395_v61  ;;  %v1401_v15 = vld [vmem:[%s3523_s6 + $0x230] sm:$0xff]  ;;  %v2306_v62 = vpack.c.bf16 %v1418_v57, %v1416_v56 }
 0x36d   : > { %2199 = vmatprep.subr.bf16.mxu1 %v2198_v18  ;;  %v1335_v18 = vld [vmem:[%s3523_s6 + $0x20] sm:$0xff]  ;;  %v2292_v19 = vpack.c.bf16 %v1401_v15, %v1399_v14  ;;  %v1369_v57 = vld [vmem:[%s3523_s6 + $0x130] sm:$0xff] }
 0x36e   : > { %2289 = vmatpush1.bf16.msra.mxu0 %v2288_v1  ;;  %v1417_v1 = vld [vmem:[%s3523_s6 + $0x2b0] sm:$0xff]  ;;  %v1419_v15 = vld [vmem:[%s3523_s6 + $0x2c0] sm:$0xff] }
 0x36f   : > { %2291 = vmatprep.subr.bf16.mxu0 %v2290_v12 }
 0x370   : > { %2201 = vmatpush3.bf16.msra.mxu1 %v2200_v23  ;;  %v2228_v23 = vpack.c.bf16 %v1337_v20, %v1335_v18  ;;  %v1421_v18 = vld [vmem:[%s3523_s6 + $0x2d0] sm:$0xff]  ;;  %v2246_v20 = vpack.c.bf16 %v1358_v11, %v1356_v10  ;;  %v1371_v11 = vld [vmem:[%s3523_s6 + $0x140] sm:$0xff] }
 0x371   : > { %2203 = vmatprep.subr.bf16.mxu1 %v2202_v24  ;;  %v2294_v24 = vpack.c.bf16 %v1406_v22, %v1404_v21  ;;  %v1357_v21 = vld [vmem:[%s3523_s6 + $0xd0] sm:$0xff]  ;;  %v1424_v22 = vld [vmem:[%s3523_s6 + $0x2e8] sm:$0xff]  ;;  %v2312_v26 = vpack.c.bf16 %v1421_v18, %v1419_v15  ;;  %v2044_v18 = vld [vmem:[%s3522_s5] ss:$0 sm:$0xff] }
 0x372   : > { %2293 = vmatpush1.bf16.msra.mxu0 %v2292_v19  ;;  %v1355_v19 = vld [vmem:[%s3523_s6 + $0xc0] sm:$0xff] }
 0x373   : > { %2295 = vmatprep.subr.bf16.mxu0 %v2294_v24  ;;  %v1360_v24 = vld [vmem:[%s3523_s6 + $0xe8] sm:$0xff] }
 0x374   : > { %2205 = vmatpush3.bf16.msra.mxu1 %v2204_v4  ;;  %v1405_v4 = vld [vmem:[%s3523_s6 + $0x250] sm:$0xff] }
 0x375   : > { %2207 = vmatprep.subr.bf16.mxu1 %v2206_v29  ;;  %v1339_v29 = vld [vmem:[%s3523_s6 + $0x40] sm:$0xff]  ;;  %v2296_v31 = vpack.c.bf16 %v1405_v4, %v1403_v27  ;;  %v2248_v27 = vpack.c.bf16 %v1357_v21, %v1355_v19  ;;  %v1442_v21 = vld [vmem:[%s3523_s6 + $0x378] sm:$0xff] }
 0x376   : > { %v1423_v4 = vld [vmem:[%s3523_s6 + $0x2e0] sm:$0xff] }
 0x377   : > { %2297 = vmatpush1.bf16.msra.mxu0 %v2296_v31  ;;  %v2250_v31 = vpack.c.bf16 %v1362_v25, %v1360_v24  ;;  %v1376_v24 = vld [vmem:[%s3523_s6 + $0x168] sm:$0xff]  ;;  %v1378_v25 = vld [vmem:[%s3523_s6 + $0x178] sm:$0xff] }
 0x378   : > { %2209 = vmatpush3.bf16.msra.mxu1 %v2208_v34  ;;  %v1344_v34 = vld [vmem:[%s3523_s6 + $0x68] sm:$0xff]  ;;  %2299 = vmatprep.subr.bf16.mxu0 %v2298_v36  ;;  %v1366_v36 = vld [vmem:[%s3523_s6 + $0x118] sm:$0xff] }
 0x379   : > { %2211 = vmatprep.subr.bf16.mxu1 %v2210_v35  ;;  %v2232_v35 = vpack.c.bf16 %v1341_v30, %v1339_v29  ;;  %v1425_v29 = vld [vmem:[%s3523_s6 + $0x2f0] sm:$0xff]  ;;  %v1359_v30 = vld [vmem:[%s3523_s6 + $0xe0] sm:$0xff] }
 0x37c   : > { %2213 = vmatpush3.bf16.msra.mxu1 %v2212_v41  ;;  %v2234_v41 = vpack.c.bf16 %v1346_v38, %v1344_v34  ;;  %v1430_v34 = vld [vmem:[%s3523_s6 + $0x318] sm:$0xff]  ;;  %v2316_v38 = vpack.c.bf16 %v1425_v29, %v1423_v4  ;;  %v1375_v4 = vld [vmem:[%s3523_s6 + $0x160] sm:$0xff]  ;;  %v1377_v29 = vld [vmem:[%s3523_s6 + $0x170] sm:$0xff] }
 0x37d   : > { %2215 = vmatprep.subr.bf16.mxu1 %v2214_v42  ;;  %v1343_v42 = vld [vmem:[%s3523_s6 + $0x60] sm:$0xff] }
 0x37e   : > { %v2236_v49 = vpack.c.bf16 %v1345_v43, %v1343_v42  ;;  %v1429_v42 = vld [vmem:[%s3523_s6 + $0x310] sm:$0xff]  ;;  %v1363_v43 = vld [vmem:[%s3523_s6 + $0x100] sm:$0xff] }
 0x380   : > { %2217 = vmatpush3.bf16.msra.mxu1 %v2216_v47  ;;  %v1350_v47 = vld [vmem:[%s3523_s6 + $0x98] sm:$0xff] }
 0x381   : > { %2219 = vmatprep.subr.bf16.mxu1 %v2218_v48  ;;  %v2300_v48 = vpack.c.bf16 %v1409_v40, %v1407_v39  ;;  %v2252_v39 = vpack.c.bf16 %v1361_v32, %v1359_v30  ;;  %v2318_v40 = vpack.c.bf16 %v1430_v34, %v1428_v33  ;;  %v2268_v34 = vpack.c.bf16 %v1377_v29, %v1375_v4 }
 0x383   : > { %2301 = vmatpush1.bf16.msra.mxu0 %v2300_v48  ;;  %v1368_v48 = vld [vmem:[%s3523_s6 + $0x128] sm:$0xff] }
 0x384   : > { %2221 = vmatpush3.bf16.msra.mxu1 %v2220_v51  ;;  %v1411_v51 = vld [vmem:[%s3523_s6 + $0x280] sm:$0xff]  ;;  %2303 = vmatprep.subr.bf16.mxu0 %v2302_v50 }
 0x385   : > { %2223 = vmatprep.subr.bf16.mxu1 %v2222_v63  ;;  %v1415_v63 = vld [vmem:[%s3523_s6 + $0x2a0] sm:$0xff] }
 0x386   : > { %v2308_v12 = vpack.c.bf16 %v1417_v1, %v1415_v63  ;;  %v2326_v1 = vpack.c.bf16 %v1438_v59, %v1436_v58 }
 0x43a   : > { %v1070_v52 = vpop.f32.mrb[18].mxu1 }
 0x43b   : > { %v1072_v53 = vpop.f32.mrb[19].mxu1 }
 0x43c   : > { %1184 = vmatprep.mubr.f32.mxu1 %v1072_v53  ;;  %v1347_v53 = vld [vmem:[%s3523_s6 + $0x80] sm:$0xff] }
 0x43d   : > { %1185 = vmatmul.mubr.f32.vlgmr.msra.gmra.mrb[22].mxu1 %v1070_v52  ;;  %v1413_v52 = vld [vmem:[%s3523_s6 + $0x290] sm:$0xff] }
 0x43e   : > { %v1076_v54 = vpop.f32.mrb[20].mxu1  ;;  %2225 = vmatpush1.bf16.msra.mxu1 %v2224_v8  ;;  %v2304_v60 = vpack.c.bf16 %v1413_v52, %v1411_v51  ;;  %v1420_v8 = vld [vmem:[%s3523_s6 + $0x2c8] sm:$0xff]  ;;  %v2256_v51 = vpack.c.bf16 %v1365_v45, %v1363_v43  ;;  %v1443_v45 = vld [vmem:[%s3523_s6 + $0x380] sm:$0xff] }
 0x43f   : > { %v1078_v55 = vpop.f32.mrb[21].mxu1  ;;  %2227 = vmatprep.subr.bf16.mxu1 %v2226_v13  ;;  %v2244_v13 = vpack.c.bf16 %v1353_v7, %v1351_v5  ;;  %v2310_v14 = vpack.c.bf16 %v1422_v9, %v1420_v8  ;;  %v1435_v5 = vld [vmem:[%s3523_s6 + $0x340] sm:$0xff]  ;;  %v2479_v9 = vmov 1966171168   ;;  %v1380_v43 = vld [vmem:[%s3523_s6 + $0x188] sm:$0xff] }
 0x440   : > { %1189 = vmatprep.mubr.f32.mxu1 %v1078_v55  ;;  %v1349_v55 = vld [vmem:[%s3523_s6 + $0x90] sm:$0xff]  ;;  %2305 = vmatpush1.bf16.msra.mxu0 %v2304_v60  ;;  %v1372_v60 = vld [vmem:[%s3523_s6 + $0x148] sm:$0xff]  ;;  %v1204_v10 = vunpack.c.l.s4 %v2479_v9 }
 0x441   : > { %1190 = vmatmul.mubr.f32.gmra.mrb[24].mxu1 %v1076_v54  ;;  %v2238_v54 = vpack.c.bf16 %v1350_v47, %v1348_v46  ;;  %v2240_v61 = vpack.c.bf16 %v1349_v55, %v1347_v53  ;;  %2307 = vmatprep.subr.bf16.mxu0 %v2306_v62  ;;  %v1432_v46 = vld [vmem:[%s3523_s6 + $0x328] sm:$0xff]  ;;  %v1434_v47 = vld [vmem:[%s3523_s6 + $0x338] sm:$0xff]  ;;  %v1431_v53 = vld [vmem:[%s3523_s6 + $0x320] sm:$0xff] }
 0x442   : > { %2229 = vmatpush1.bf16.msra.mxu1 %v2228_v23  ;;  %v1426_v23 = vld [vmem:[%s3523_s6 + $0x2f8] sm:$0xff]  ;;  %v2322_v52 = vpack.c.bf16 %v1434_v47, %v1432_v46  ;;  %v1367_v55 = vld [vmem:[%s3523_s6 + $0x120] sm:$0xff]  ;;  %v1445_v47 = vld [vmem:[%s3523_s6 + $0x390] sm:$0xff] }
 0x443   : > { %2231 = vmatprep.subr.bf16.mxu1 %v2230_v28  ;;  %v2314_v28 = vpack.c.bf16 %v1426_v23, %v1424_v22  ;;  %v2260_v63 = vpack.c.bf16 %v1369_v57, %v1367_v55  ;;  %v1448_v55 = vld [vmem:[%s3523_s6 + $0x3a8] sm:$0xff]  ;;  %v1385_v9 = vld [vmem:[%s3523_s6 + $0x1b0] sm:$0xff] }
 0x444   : > { %2309 = vmatpush1.bf16.msra.mxu0 %v2308_v12  ;;  %v1373_v12 = vld [vmem:[%s3523_s6 + $0x150] sm:$0xff]  ;;  %v1384_v57 = vld [vmem:[%s3523_s6 + $0x1a8] sm:$0xff] }
 0x445   : > { %2311 = vmatprep.subr.bf16.mxu0 %v2310_v14  ;;  %v1205_v14 = vunpack.c.0.s8 %v1204_v10  ;;  %v2264_v15 = vpack.c.bf16 %v1373_v12, %v1371_v11 }
 0x446   : > { %2233 = vmatpush1.bf16.msra.mxu1 %v2232_v35  ;;  %v1364_v35 = vld [vmem:[%s3523_s6 + $0x108] sm:$0xff] }
 0x447   : > { %2235 = vmatprep.subr.bf16.mxu1 %v2234_v41  ;;  %v1427_v41 = vld [vmem:[%s3523_s6 + $0x300] sm:$0xff]  ;;  %v2254_v44 = vpack.c.bf16 %v1366_v36, %v1364_v35 }
 0x448   : > { %2313 = vmatpush1.bf16.msra.mxu0 %v2312_v26  ;;  %v2320_v50 = vpack.c.bf16 %v1429_v42, %v1427_v41  ;;  %v1439_v26 = vld [vmem:[%s3523_s6 + $0x360] sm:$0xff] }
 0x449   : > { %2315 = vmatprep.subr.bf16.mxu0 %v2314_v28  ;;  %v1441_v28 = vld [vmem:[%s3523_s6 + $0x370] sm:$0xff] }
 0x44a   : > { %2237 = vmatpush1.bf16.msra.mxu1 %v2236_v49  ;;  %v1370_v49 = vld [vmem:[%s3523_s6 + $0x138] sm:$0xff]  ;;  %v2332_v33 = vpack.c.bf16 %v1441_v28, %v1439_v26  ;;  %v1451_v26 = vld [vmem:[%s3523_s6 + $0x3c0] sm:$0xff] }
 0x44b   : > { %2239 = vmatprep.subr.bf16.mxu1 %v2238_v54  ;;  %v1433_v54 = vld [vmem:[%s3523_s6 + $0x330] sm:$0xff]  ;;  %v2258_v56 = vpack.c.bf16 %v1370_v49, %v1368_v48  ;;  %v1379_v48 = vld [vmem:[%s3523_s6 + $0x180] sm:$0xff] }
 0x44c   : > { %2317 = vmatpush1.bf16.msra.mxu0 %v2316_v38  ;;  %v2324_v62 = vpack.c.bf16 %v1433_v54, %v1431_v53  ;;  %v1444_v38 = vld [vmem:[%s3523_s6 + $0x388] sm:$0xff]  ;;  %v1381_v49 = vld [vmem:[%s3523_s6 + $0x190] sm:$0xff]  ;;  %v2336_v53 = vpack.c.bf16 %v1445_v47, %v1443_v45  ;;  %v1455_v47 = vld [vmem:[%s3523_s6 + $0x3e0] sm:$0xff] }
 0x44d   : > { %2319 = vmatprep.subr.bf16.mxu0 %v2318_v40  ;;  %v2272_v54 = vpack.c.bf16 %v1381_v49, %v1379_v48  ;;  %v1457_v48 = vld [vmem:[%s3523_s6 + $0x3f0] sm:$0xff]  ;;  %v1391_v49 = vld [vmem:[%s3523_s6 + $0x1e0] sm:$0xff] }
 0x44e   : > { %2241 = vmatpush1.bf16.msra.mxu1 %v2240_v61  ;;  %v1374_v61 = vld [vmem:[%s3523_s6 + $0x158] sm:$0xff] }
 0x44f   : > { %2243 = vmatprep.subr.bf16.mxu1 %v2242_v6  ;;  %v1437_v6 = vld [vmem:[%s3523_s6 + $0x350] sm:$0xff]  ;;  %v2262_v7 = vpack.c.bf16 %v1374_v61, %v1372_v60 }
 0x450   : > { %2321 = vmatpush1.bf16.msra.mxu0 %v2320_v50  ;;  %v2328_v8 = vpack.c.bf16 %v1437_v6, %v1435_v5 }
 0x451   : > { %2323 = vmatprep.subr.bf16.mxu0 %v2322_v52 }
 0x452   : > { %2245 = vmatpush1.bf16.msra.mxu1 %v2244_v13 }
 0x453   : > { %2247 = vmatprep.subr.bf16.mxu1 %v2246_v20  ;;  %v1440_v20 = vld [vmem:[%s3523_s6 + $0x368] sm:$0xff] }
 0x454   : > { %2325 = vmatpush1.bf16.msra.mxu0 %v2324_v62  ;;  %v2330_v23 = vpack.c.bf16 %v1442_v21, %v1440_v20  ;;  %v1386_v62 = vld [vmem:[%s3523_s6 + $0x1b8] sm:$0xff]  ;;  %v1388_v21 = vld [vmem:[%s3523_s6 + $0x1c8] sm:$0xff] }
 0x455   : > { %2327 = vmatprep.subr.bf16.mxu0 %v2326_v1  ;;  %v1449_v1 = vld [vmem:[%s3523_s6 + $0x3b0] sm:$0xff]  ;;  %v2274_v6 = vpack.c.bf16 %v1386_v62, %v1384_v57  ;;  %v1454_v20 = vld [vmem:[%s3523_s6 + $0x3d8] sm:$0xff] }
 0x456   : > { %2249 = vmatpush1.bf16.msra.mxu1 %v2248_v27  ;;  %v2266_v27 = vpack.c.bf16 %v1378_v25, %v1376_v24  ;;  %v1390_v25 = vld [vmem:[%s3523_s6 + $0x1d8] sm:$0xff] }
 0x457   : > { %2251 = vmatprep.subr.bf16.mxu1 %v2250_v31  ;;  %v3097_v31 = vsub.s32 %v1205_v14, %v2537_v2  ;;  %v1462_v57 = vld [vmem:[%s3523_s6 + $0x418] sm:$0xff] }
 0x458   : > { %2329 = vmatpush1.bf16.msra.mxu0 %v2328_v8  ;;  %v1383_v8 = vld [vmem:[%s3523_s6 + $0x1a0] sm:$0xff] }
 0x459   : > { %2331 = vmatprep.subr.bf16.mxu0 %v2330_v23 }
 0x45a   : > { %2253 = vmatpush1.bf16.msra.mxu1 %v2252_v39  ;;  %v1446_v39 = vld [vmem:[%s3523_s6 + $0x398] sm:$0xff] }
 0x45b   : > { %2255 = vmatprep.subr.bf16.mxu1 %v2254_v44  ;;  %v2334_v42 = vpack.c.bf16 %v1446_v39, %v1444_v38  ;;  %v1382_v44 = vld [vmem:[%s3523_s6 + $0x198] sm:$0xff]  ;;  %v2278_v39 = vpack.c.bf16 %v1390_v25, %v1388_v21  ;;  %v1465_v21 = vld [vmem:[%s3523_s6 + $0x430] sm:$0xff] }
 0x45c   : > { %2333 = vmatpush1.bf16.msra.mxu0 %v2332_v33  ;;  %v2270_v46 = vpack.c.bf16 %v1382_v44, %v1380_v43  ;;  %v1456_v33 = vld [vmem:[%s3523_s6 + $0x3e8] sm:$0xff] }
 0x45d   : > { %2335 = vmatprep.subr.bf16.mxu0 %v2334_v42  ;;  %v1394_v42 = vld [vmem:[%s3523_s6 + $0x1f8] sm:$0xff] }
 0x45e   : > { %2257 = vmatpush1.bf16.msra.mxu1 %v2256_v51 }
 0x45f   : > { %2259 = vmatprep.subr.bf16.mxu1 %v2258_v56  ;;  %v1450_v56 = vld [vmem:[%s3523_s6 + $0x3b8] sm:$0xff] }
 0x460   : > { %2337 = vmatpush1.bf16.msra.mxu0 %v2336_v53  ;;  %v2338_v5 = vpack.c.bf16 %v1450_v56, %v1448_v55  ;;  %v2348_v53 = vpack.c.bf16 %v1457_v48, %v1455_v47  ;;  %v1460_v56 = vld [vmem:[%s3523_s6 + $0x408] sm:$0xff]  ;;  %v1479_v47 = vld [vmem:[%s3523_s6 + $0x4a0] sm:$0xff]  ;;  %v1481_v48 = vld [vmem:[%s3523_s6 + $0x4b0] sm:$0xff] }
 0x461   : > { %v2350_v36 = vpack.c.bf16 %v1462_v57, %v1460_v56  ;;  %v1490_v56 = vld [vmem:[%s3523_s6 + $0x4f8] sm:$0xff] }
 0x462   : > { %2261 = vmatpush1.bf16.msra.mxu1 %v2260_v63  ;;  %v1447_v63 = vld [vmem:[%s3523_s6 + $0x3a0] sm:$0xff]  ;;  %2339 = vmatprep.subr.bf16.mxu0 %v2338_v5  ;;  %v1551_v5 = vsub.s32 2, %v2537_v2 }
 0x463   : > { %2263 = vmatprep.subr.bf16.mxu1 %v2262_v7  ;;  %v2340_v7 = vpack.c.bf16 %v1449_v1, %v1447_v63  ;;  %v1555_v1 = vsub.s32 3, %v2537_v2 }
 0x465   : > { %2341 = vmatpush1.bf16.msra.mxu0 %v2340_v7  ;;  %v1461_v7 = vld [vmem:[%s3523_s6 + $0x410] sm:$0xff] }
 0x466   : > { %2265 = vmatpush1.bf16.msra.mxu1 %v2264_v15 }
 0x467   : > { %2267 = vmatprep.subr.bf16.mxu1 %v2266_v27  ;;  %v1453_v27 = vld [vmem:[%s3523_s6 + $0x3d0] sm:$0xff] }
 0x468   : > { %v2344_v44 = vpack.c.bf16 %v1453_v27, %v1451_v26  ;;  %v1467_v27 = vld [vmem:[%s3523_s6 + $0x440] sm:$0xff] }
 0x46a   : > { %2269 = vmatpush1.bf16.msra.mxu1 %v2268_v34 }
 0x46b   : > { %2271 = vmatprep.subr.bf16.mxu1 %v2270_v46 }
 0x46e   : > { %2273 = vmatpush1.bf16.msra.mxu1 %v2272_v54 }
 0x46f   : > { %2275 = vmatprep.subr.bf16.mxu1 %v2274_v6  ;;  %v1459_v6 = vld [vmem:[%s3523_s6 + $0x400] sm:$0xff] }
 0x510   : > { %v2105_v13 = vpop.f32.mrb[22].mxu1 }
 0x511   : > { %v2106_v19 = vpop.f32.mrb[23].mxu1 }
 0x512   : > { %v2107_v22 = vadd.f32 %v2106_v19, %v2105_v13  ;;  %v1452_v19 = vld [vmem:[%s3523_s6 + $0x3c8] sm:$0xff] }
 0x513   : > { %v2342_v29 = vpack.c.bf16 %v1454_v20, %v1452_v19  ;;  %v1463_v20 = vld [vmem:[%s3523_s6 + $0x420] sm:$0xff] }
 0x514   : > { %v1187_v30 = vadd.f32 %v2107_v22, %v2044_v18  ;;  %v2108_v32 = vpop.f32.mrb[24].mxu1  ;;  %v2356_v25 = vpack.c.bf16 %v1465_v21, %v1463_v20  ;;  %v1501_v20 = vld [vmem:[%s3523_s6 + $0x550] sm:$0xff]  ;;  %v1504_v21 = vld [vmem:[%s3523_s6 + $0x568] sm:$0xff] }
 0x515   : > { %v2109_v35 = vpop.f32.mrb[25].mxu1  ;;  %2343 = vmatprep.subr.bf16.mxu0 %v2342_v29  ;;  %v1474_v29 = vld [vmem:[%s3523_s6 + $0x478] sm:$0xff] }
 0x516   : > { %v1195_v40 = vmax.f32 %v1187_v30, 0.0  ;;  %v2110_v41 = vadd.f32 %v2109_v35, %v2108_v32  ;;  %v1387_v30 = vld [vmem:[%s3523_s6 + $0x1c0] sm:$0xff]  ;;  %v1389_v32 = vld [vmem:[%s3523_s6 + $0x1d0] sm:$0xff]  ;;  %2345 = vmatpush1.bf16.msra.mxu0 %v2344_v44  ;;  %v1482_v44 = vld [vmem:[%s3523_s6 + $0x4b8] sm:$0xff] }
 0x517   : > { %v2280_v45 = vpack.c.bf16 %v1389_v32, %v1387_v30 }
 0x518   : > { %v1209_v50 = vrot.slane %v1195_v40, %v3097_v31  ;;  %v1240_v51 = vcombine.high %v1195_v40, %v1195_v40  ;;  %v1192_v52 = vadd.f32 %v2110_v41, %v2044_v18  ;;  %1201 = vst.msk [vmem:[#allocation2] sm:$0x1] %vm3100_vm7, %v1195_v40  ;;  %v2276_v18 = vpack.c.bf16 %v1385_v9, %v1383_v8  ;;  %v1458_v40 = vld [vmem:[%s3523_s6 + $0x3f8] sm:$0xff]  ;;  %v1392_v41 = vld [vmem:[%s3523_s6 + $0x1e8] sm:$0xff] }
 0x519   : > { %v2346_v46 = vpack.c.bf16 %v1458_v40, %v1456_v33  ;;  %v1563_v8 = vsub.s32 5, %v2537_v2  ;;  %v1464_v9 = vld [vmem:[%s3523_s6 + $0x428] sm:$0xff]  ;;  %v1471_v33 = vld [vmem:[%s3523_s6 + $0x460] sm:$0xff] }
 0x51a   : > { %v1196_v58 = vmax.f32 %v1192_v52, 0.0  ;;  %v1210_v59 = vcombine.high %v1209_v50, %v1209_v50  ;;  %v1247_v60 = vrot.slane %v1240_v51, %v3097_v31  ;;  %v1217_v61 = vrot.slane %v1209_v50, %v3097_v31  ;;  %2277 = vmatpush1.bf16.msra.mxu1 %v2276_v18  ;;  %v1393_v52 = vld [vmem:[%s3523_s6 + $0x1f0] sm:$0xff] }
 0x51b   : > { %2279 = vmatprep.subr.bf16.mxu1 %v2278_v39  ;;  %v2282_v51 = vpack.c.bf16 %v1394_v42, %v1392_v41  ;;  %v2284_v54 = vpack.c.bf16 %v1393_v52, %v1391_v49  ;;  %2347 = vmatprep.subr.bf16.mxu0 %v2346_v46  ;;  %v1475_v41 = vld [vmem:[%s3523_s6 + $0x480] sm:$0xff]  ;;  %v1477_v42 = vld [vmem:[%s3523_s6 + $0x490] sm:$0xff]  ;;  %v1484_v49 = vld [vmem:[%s3523_s6 + $0x4c8] sm:$0xff] }
 0x51c   : > { %v1285_v10 = vrot.slane %v1196_v58, %v3097_v31  ;;  %v1313_v11 = vcombine.high %v1196_v58, %v1196_v58  ;;  %1277 = vst.msk [vmem:[#allocation2 + $0x4] sm:$0x1] %vm3100_vm7, %v1196_v58  ;;  %v1224_v12 = vrot.slane %v1210_v59, %v3097_v31  ;;  %v1257_v13 = vcombine.high %v1247_v60, %v1247_v60 }
 0x51d   : > { %v1232_v14 = vcombine.high %v1217_v61, %v1217_v61  ;;  %v1254_v15 = vrot.slane %v1247_v60, %v3097_v31  ;;  %2349 = vmatpush1.bf16.msra.mxu0 %v2348_v53  ;;  %v1483_v53 = vld [vmem:[%s3523_s6 + $0x4c0] sm:$0xff] }
 0x51e   : > { %v1320_v22 = vrot.slane %v1313_v11, %v3097_v31  ;;  %1225 = vrot.lane.b32.xlu1 %v1224_v12, %s2480_s13  ;;  %v1235_v23 = vcombine.high %v1224_v12, %v1224_v12  ;;  %v1286_v24 = vcombine.high %v1285_v10, %v1285_v10  ;;  %v1293_v28 = vrot.slane %v1285_v10, %v3097_v31  ;;  %v1466_v10 = vld [vmem:[%s3523_s6 + $0x438] sm:$0xff] }
 0x51f   : > { %1234 = vst.msk [vmem:[#allocation2 + $0x1] sm:$0x1] %vm3100_vm7, %v1232_v14  ;;  %1256 = vst.msk [vmem:[#allocation2 + $0x2] sm:$0x1] %vm3100_vm7, %v1254_v15  ;;  %v1269_v4 = vcombine.high %v1254_v15, %v1254_v15  ;;  %v1264_v35 = vrot.slane %v1257_v13, %v3097_v31  ;;  %2281 = vmatpush1.bf16.msra.mxu1 %v2280_v45  ;;  %2351 = vmatprep.subr.bf16.mxu0 %v2350_v36 }
 0x520   : > { %v1327_v34 = vrot.slane %v1320_v22, %v3097_v31  ;;  %1236 = vrot.lane.b32.xlu0 %v1235_v23, %s2480_s13  ;;  %v1300_v38 = vrot.slane %v1286_v24, %v3097_v31  ;;  %v1305_v43 = vcombine.high %v1293_v28, %v1293_v28  ;;  %2283 = vmatprep.subr.bf16.mxu1 %v2282_v51  ;;  %v1468_v23 = vld [vmem:[%s3523_s6 + $0x448] sm:$0xff]  ;;  %v1470_v24 = vld [vmem:[%s3523_s6 + $0x458] sm:$0xff]  ;;  %v1469_v28 = vld [vmem:[%s3523_s6 + $0x450] sm:$0xff] }
 0x521   : > { %1271 = vst.msk [vmem:[#allocation2 + $0x3] sm:$0x1] %vm3100_vm7, %v1269_v4  ;;  %v1272_v55 = vcombine.high %v1264_v35, %v1264_v35  ;;  %v2352_v12 = vpack.c.bf16 %v1461_v7, %v1459_v6  ;;  %v2354_v19 = vpack.c.bf16 %v1466_v10, %v1464_v9  ;;  %v2358_v26 = vpack.c.bf16 %v1470_v24, %v1468_v23  ;;  %v1472_v4 = vld [vmem:[%s3523_s6 + $0x468] sm:$0xff]  ;;  %v1498_v7 = vld [vmem:[%s3523_s6 + $0x538] sm:$0xff]  ;;  %v1495_v10 = vld [vmem:[%s3523_s6 + $0x520] sm:$0xff] }
 0x522   : > { %1329 = vst.msk [vmem:[#allocation2 + $0x6] sm:$0x1] %vm3100_vm7, %v1327_v34  ;;  %1265 = vrot.lane.b32.xlu1 %v1264_v35, %s2480_s13  ;;  %v1308_v50 = vcombine.high %v1300_v38, %v1300_v38  ;;  %1307 = vst.msk [vmem:[#allocation2 + $0x5] sm:$0x1] %vm3100_vm7, %v1305_v43  ;;  %v2360_v30 = vpack.c.bf16 %v1469_v28, %v1467_v27  ;;  %v2362_v32 = vpack.c.bf16 %v1474_v29, %v1472_v4  ;;  %v1473_v34 = vld [vmem:[%s3523_s6 + $0x470] sm:$0xff]  ;;  %v1476_v35 = vld [vmem:[%s3523_s6 + $0x488] sm:$0xff] }
 0x523   : > { %2285 = vmatpush1.bf16.msra.mxu1 %v2284_v54  ;;  %v2364_v39 = vpack.c.bf16 %v1473_v34, %v1471_v33  ;;  %v1480_v43 = vld [vmem:[%s3523_s6 + $0x4a8] sm:$0xff]  ;;  %v2368_v45 = vpack.c.bf16 %v1477_v42, %v1475_v41  ;;  %v2372_v51 = vpack.c.bf16 %v1481_v48, %v1479_v47  ;;  %v1485_v54 = vld [vmem:[%s3523_s6 + $0x4d0] sm:$0xff]  ;;  %v1510_v28 = vld [vmem:[%s3523_s6 + $0x598] sm:$0xff] }
 0x524   : > { %1309 = vrot.lane.b32.xlu0 %v1308_v50, %s2480_s13  ;;  %v2370_v46 = vpack.c.bf16 %v1482_v44, %v1480_v43  ;;  %v1486_v50 = vld [vmem:[%s3523_s6 + $0x4d8] sm:$0xff]  ;;  %v2376_v57 = vpack.c.bf16 %v1485_v54, %v1483_v53  ;;  %v1496_v6 = vld [vmem:[%s3523_s6 + $0x528] sm:$0xff] }
 0x525   : > { %v2374_v52 = vpack.c.bf16 %v1486_v50, %v1484_v49  ;;  %v2386_v9 = vpack.c.bf16 %v1498_v7, %v1496_v6  ;;  %v1508_v27 = vld [vmem:[%s3523_s6 + $0x588] sm:$0xff]  ;;  %v1514_v34 = vld [vmem:[%s3523_s6 + $0x5b8] sm:$0xff] }
 0x526   : > { %1273 = vrot.lane.b32.xlu1 %v1272_v55, %s2480_s13  ;;  %v1488_v55 = vld [vmem:[%s3523_s6 + $0x4e8] sm:$0xff]  ;;  %v2398_v29 = vpack.c.bf16 %v1510_v28, %v1508_v27  ;;  %v1518_v42 = vld [vmem:[%s3523_s6 + $0x5d8] sm:$0xff] }
 0x527   : > { %v2378_v36 = vpack.c.bf16 %v1490_v56, %v1488_v55  ;;  %v1512_v33 = vld [vmem:[%s3523_s6 + $0x5a8] sm:$0xff]  ;;  %v1522_v48 = vld [vmem:[%s3523_s6 + $0x5f8] sm:$0xff]  ;;  %v1559_v56 = vsub.s32 4, %v2537_v2 }
 0x528   : > { %v1516_v41 = vld [vmem:[%s3523_s6 + $0x5c8] sm:$0xff]  ;;  %v1526_v54 = vld [vmem:[%s3523_s6 + $0x618] sm:$0xff] }
 0x529   : > { %v2406_v44 = vpack.c.bf16 %v1518_v42, %v1516_v41  ;;  %v1520_v47 = vld [vmem:[%s3523_s6 + $0x5e8] sm:$0xff]  ;;  %v1534_v7 = vld [vmem:[%s3523_s6 + $0x658] sm:$0xff] }
 0x52a   : > { %1301 = vrot.lane.b32.xlu1 %v1300_v38, %s2480_s13  ;;  %v1478_v38 = vld [vmem:[%s3523_s6 + $0x498] sm:$0xff]  ;;  %v2410_v50 = vpack.c.bf16 %v1522_v48, %v1520_v47  ;;  %v1524_v53 = vld [vmem:[%s3523_s6 + $0x608] sm:$0xff] }
 0x52b   : > { %v2366_v40 = vpack.c.bf16 %v1478_v38, %v1476_v35  ;;  %v2402_v38 = vpack.c.bf16 %v1514_v34, %v1512_v33  ;;  %v1532_v6 = vld [vmem:[%s3523_s6 + $0x648] sm:$0xff] }
 0x590   : > { %v1226_v58 = vpop.permute.xlu1 %1225 }
 0x591   : > { %1231 = vst.msk [vmem:[#allocation2] sm:$0x1] %vm1230_vm4, %v1226_v58  ;;  %v1487_v58 = vld [vmem:[%s3523_s6 + $0x4e0] sm:$0xff] }
 0x592   : > { %v1237_v59 = vpop.permute.xlu0 %1236 }
 0x593   : > { %1239 = vst.msk [vmem:[#allocation2 + $0x1] sm:$0x1] %vm1230_vm4, %v1237_v59  ;;  %v1489_v59 = vld [vmem:[%s3523_s6 + $0x4f0] sm:$0xff] }
 0x594   : > { %v1266_v60 = vpop.permute.xlu1 %1265 }
 0x595   : > { %1268 = vst.msk [vmem:[#allocation2 + $0x2] sm:$0x1] %vm1230_vm4, %v1266_v60  ;;  %v1492_v60 = vld [vmem:[%s3523_s6 + $0x508] sm:$0xff] }
 0x596   : > { %v1310_v61 = vpop.permute.xlu0 %1309 }
 0x597   : > { %1312 = vst.msk [vmem:[#allocation2 + $0x5] sm:$0x1] %vm1230_vm4, %v1310_v61  ;;  %v1494_v61 = vld [vmem:[%s3523_s6 + $0x518] sm:$0xff] }
 0x598   : > { %v1274_v62 = vpop.permute.xlu1 %1273 }
 0x599   : > { %1276 = vst.msk [vmem:[#allocation2 + $0x3] sm:$0x1] %vm1230_vm4, %v1274_v62  ;;  %v2380_v62 = vpack.c.bf16 %v1489_v59, %v1487_v58  ;;  %v1525_v58 = vld [vmem:[%s3523_s6 + $0x610] sm:$0xff]  ;;  %v1528_v59 = vld [vmem:[%s3523_s6 + $0x628] sm:$0xff] }
 0x59c   : > { %v1302_v63 = vpop.permute.xlu1 %1301 }
 0x59d   : > { %1304 = vst.msk [vmem:[#allocation2 + $0x4] sm:$0x1] %vm1230_vm4, %v1302_v63  ;;  %v2382_v63 = vpack.c.bf16 %v1494_v61, %v1492_v60  ;;  %v1530_v60 = vld [vmem:[%s3523_s6 + $0x638] sm:$0xff] }
 0x5a4   : > { %v3254_v11 = vld [vmem:[#allocation2] sm:$0x7f] }
 0x5a5   : > { %v1548_v13 = vrot.slane %v3254_v11, %v2700_v37  ;;  %v1556_v14 = vrot.slane %v3254_v11, %v1555_v1  ;;  %v1544_v15 = vrot.slane %v3254_v11, %v2647_v16  ;;  %v1552_v18 = vrot.slane %v3254_v11, %v1551_v5  ;;  %v1491_v1 = vld [vmem:[%s3523_s6 + $0x500] sm:$0xff]  ;;  %v1493_v5 = vld [vmem:[%s3523_s6 + $0x510] sm:$0xff] }
 0x5a6   : > { %v1564_v22 = vrot.slane %v3254_v11, %v1563_v8  ;;  %v2384_v8 = vpack.c.bf16 %v1493_v5, %v1491_v1  ;;  %v1527_v1 = vld [vmem:[%s3523_s6 + $0x620] sm:$0xff]  ;;  %v1529_v5 = vld [vmem:[%s3523_s6 + $0x630] sm:$0xff] }
 0x5a7   : > { %1653 = vmatprep.mubr.f32.mxu1 %v1548_v13  ;;  %1724 = vmatprep.mubr.f32.mxu0 %v1556_v14  ;;  %v1500_v13 = vld [vmem:[%s3523_s6 + $0x548] sm:$0xff]  ;;  %v1502_v14 = vld [vmem:[%s3523_s6 + $0x558] sm:$0xff] }
 0x5a8   : > { %1654 = vmatmul.mubr.f32.vlgmr.msra.gmra.mrb[26].mxu1 %v1544_v15  ;;  %1725 = vmatmul.mubr.f32.vlgmr.msra.gmra.mrb[6].mxu0 %v1552_v18  ;;  %v2390_v18 = vpack.c.bf16 %v1502_v14, %v1500_v13  ;;  %v1536_v13 = vld [vmem:[%s3523_s6 + $0x668] sm:$0xff]  ;;  %v1538_v14 = vld [vmem:[%s3523_s6 + $0x678] sm:$0xff] }
 0x5a9   : > { %2353 = vmatpush1.bf16.msra.mxu0 %v2352_v12  ;;  %1795 = vmatprep.mubr.f32.mxu0 %v1564_v22  ;;  %v1497_v12 = vld [vmem:[%s3523_s6 + $0x530] sm:$0xff]  ;;  %v1506_v22 = vld [vmem:[%s3523_s6 + $0x578] sm:$0xff] }
 0x5aa   : > { %2355 = vmatprep.subr.bf16.mxu0 %v2354_v19  ;;  %v2388_v15 = vpack.c.bf16 %v1497_v12, %v1495_v10  ;;  %v1499_v19 = vld [vmem:[%s3523_s6 + $0x540] sm:$0xff]  ;;  %v2394_v24 = vpack.c.bf16 %v1506_v22, %v1504_v21  ;;  %v1533_v12 = vld [vmem:[%s3523_s6 + $0x650] sm:$0xff]  ;;  %v1567_v21 = vsub.s32 6, %v2537_v2 }
 0x5ab   : > { %v2392_v23 = vpack.c.bf16 %v1501_v20, %v1499_v19  ;;  %v1531_v10 = vld [vmem:[%s3523_s6 + $0x640] sm:$0xff]  ;;  %v1537_v19 = vld [vmem:[%s3523_s6 + $0x670] sm:$0xff] }
 0x5ac   : > { %v1568_v22 = vrot.slane %v3254_v11, %v1567_v21 }
 0x5ad   : > { %2357 = vmatpush1.bf16.msra.mxu0 %v2356_v25  ;;  %v1503_v25 = vld [vmem:[%s3523_s6 + $0x560] sm:$0xff] }
 0x5ae   : > { %2359 = vmatprep.subr.bf16.mxu0 %v2358_v26  ;;  %v1505_v26 = vld [vmem:[%s3523_s6 + $0x570] sm:$0xff] }
 0x5af   : > { %v2396_v4 = vpack.c.bf16 %v1505_v26, %v1503_v25  ;;  %v1539_v25 = vld [vmem:[%s3524_s7] sm:$0x3] }
 0x5b0   : > { %v1579_v26 = vrot.slane %v1539_v25, %v2647_v16  ;;  %v1583_v27 = vrot.slane %v1539_v25, %v2700_v37 }
 0x5b1   : > { %2361 = vmatpush1.bf16.msra.mxu0 %v2360_v30  ;;  %v1507_v30 = vld [vmem:[%s3523_s6 + $0x580] sm:$0xff] }
 0x5b2   : > { %2363 = vmatprep.subr.bf16.mxu0 %v2362_v32  ;;  %v1509_v32 = vld [vmem:[%s3523_s6 + $0x590] sm:$0xff] }
 0x5b3   : > { %v2400_v35 = vpack.c.bf16 %v1509_v32, %v1507_v30 }
 0x5b5   : > { %2365 = vmatpush1.bf16.msra.mxu0 %v2364_v39  ;;  %v1511_v39 = vld [vmem:[%s3523_s6 + $0x5a0] sm:$0xff] }
 0x5b6   : > { %2367 = vmatprep.subr.bf16.mxu0 %v2366_v40  ;;  %v1513_v40 = vld [vmem:[%s3523_s6 + $0x5b0] sm:$0xff] }
 0x5b7   : > { %v2404_v43 = vpack.c.bf16 %v1513_v40, %v1511_v39 }
 0x5b9   : > { %2369 = vmatpush1.bf16.msra.mxu0 %v2368_v45  ;;  %v1515_v45 = vld [vmem:[%s3523_s6 + $0x5c0] sm:$0xff] }
 0x5ba   : > { %2371 = vmatprep.subr.bf16.mxu0 %v2370_v46  ;;  %v1517_v46 = vld [vmem:[%s3523_s6 + $0x5d0] sm:$0xff] }
 0x5bb   : > { %v2408_v49 = vpack.c.bf16 %v1517_v46, %v1515_v45 }
 0x5bd   : > { %2373 = vmatpush1.bf16.msra.mxu0 %v2372_v51  ;;  %v1519_v51 = vld [vmem:[%s3523_s6 + $0x5e0] sm:$0xff] }
 0x5be   : > { %2375 = vmatprep.subr.bf16.mxu0 %v2374_v52  ;;  %v1521_v52 = vld [vmem:[%s3523_s6 + $0x5f0] sm:$0xff] }
 0x5bf   : > { %v2412_v55 = vpack.c.bf16 %v1521_v52, %v1519_v51 }
 0x5c1   : > { %2377 = vmatpush1.bf16.msra.mxu0 %v2376_v57  ;;  %v2414_v57 = vpack.c.bf16 %v1526_v54, %v1524_v53 }
 0x5c2   : > { %2379 = vmatprep.subr.bf16.mxu0 %v2378_v36  ;;  %v1523_v36 = vld [vmem:[%s3523_s6 + $0x600] sm:$0xff] }
 0x5c3   : > { %v2416_v61 = vpack.c.bf16 %v1525_v58, %v1523_v36 }
 0x5c5   : > { %2381 = vmatpush1.bf16.msra.mxu0 %v2380_v62  ;;  %v1560_v62 = vrot.slane %v3254_v11, %v1559_v56 }
 0x5c6   : > { %2383 = vmatprep.subr.bf16.mxu0 %v2382_v63  ;;  %v2418_v63 = vpack.c.bf16 %v1530_v60, %v1528_v59 }
 0x5c9   : > { %2385 = vmatpush1.bf16.msra.mxu0 %v2384_v8  ;;  %v2420_v8 = vpack.c.bf16 %v1529_v5, %v1527_v1 }
 0x5ca   : > { %2387 = vmatprep.subr.bf16.mxu0 %v2386_v9  ;;  %v2422_v9 = vpack.c.bf16 %v1534_v7, %v1532_v6 }
 0x5cd   : > { %2389 = vmatpush1.bf16.msra.mxu0 %v2388_v15  ;;  %v2426_v15 = vpack.c.bf16 %v1538_v14, %v1536_v13 }
 0x5ce   : > { %2391 = vmatprep.subr.bf16.mxu0 %v2390_v18  ;;  %v1535_v18 = vld [vmem:[%s3523_s6 + $0x660] sm:$0xff] }
 0x5cf   : > { %v2428_v20 = vpack.c.bf16 %v1537_v19, %v1535_v18 }
 0x5d1   : > { %2393 = vmatpush1.bf16.msra.mxu0 %v2392_v23 }
 0x5d2   : > { %2395 = vmatprep.subr.bf16.mxu0 %v2394_v24 }
 0x5d5   : > { %2397 = vmatpush1.bf16.msra.mxu0 %v2396_v4 }
 0x5d6   : > { %2399 = vmatprep.subr.bf16.mxu0 %v2398_v29 }
 0x5d9   : > { %2401 = vmatpush1.bf16.msra.mxu0 %v2400_v35 }
 0x5da   : > { %2403 = vmatprep.subr.bf16.mxu0 %v2402_v38 }
 0x5dd   : > { %2405 = vmatpush1.bf16.msra.mxu0 %v2404_v43 }
 0x5de   : > { %2407 = vmatprep.subr.bf16.mxu0 %v2406_v44 }
 0x5e1   : > { %2409 = vmatpush1.bf16.msra.mxu0 %v2408_v49 }
 0x5e2   : > { %2411 = vmatprep.subr.bf16.mxu0 %v2410_v50 }
 0x5e5   : > { %2413 = vmatpush1.bf16.msra.mxu0 %v2412_v55 }
 0x5e6   : > { %2415 = vmatprep.subr.bf16.mxu0 %v2414_v57 }
 0x5e8   : > { %1796 = vmatmul.mubr.f32.vlgmr.msra.gmra.mrb[6].mxu0 %v1560_v62 }
 0x5e9   : > { %2417 = vmatpush1.bf16.msra.mxu0 %v2416_v61  ;;  %1866 = vmatprep.mubr.f32.mxu0 %v2476_v3  ;;  %v2424_v3 = vpack.c.bf16 %v1533_v12, %v1531_v10 }
 0x5ea   : > { %2419 = vmatprep.subr.bf16.mxu0 %v2418_v63 }
 0x5ed   : > { %2421 = vmatpush1.bf16.msra.mxu0 %v2420_v8 }
 0x5ee   : > { %2423 = vmatprep.subr.bf16.mxu0 %v2422_v9 }
 0x5f1   : > { %2425 = vmatpush1.bf16.msra.mxu0 %v2424_v3 }
 0x5f2   : > { %2427 = vmatprep.subr.bf16.mxu0 %v2426_v15 }
 0x5f5   : > { %2429 = vmatpush1.bf16.msra.mxu0 %v2428_v20 }
 0x5f8   : > { %2045 = vmatmul.mubr.msk.f32.vlgmr.msra.gmra.mrb[6].mxu0 %vm1586_vm5, %v1568_v22 }
 0x67b   : > { %v1655_v23 = vpop.f32.mrb[26].mxu1 }
 0x67c   : > { %v1657_v24 = vpop.f32.mrb[27].mxu1  ;;  %v1656_v28 = vadd.f32 %v1655_v23, %v1579_v26 }
 0x67d   : > { %v1658_v4 = vadd.f32 %v1657_v24, %v1583_v27 }
 0x6cb   : > { %v1868_v29 = vpop.f32.mrb[6].mxu0 }
 0x6cc   : > { %v2431_v2 = vadd.f32 %v1868_v29, %v1656_v28  ;;  %v1870_v30 = vpop.f32.mrb[7].mxu0 }
 0x6cd   : > { %v2433_v11 = vadd.f32 %v1870_v30, %v1658_v4 }
 0x6ce   : > { %v1876_v32 = vsel %vm1874_vm6, %v2431_v2, -1e+30 }
 0x6cf   : > { %v1879_v33 = vsel %vm1878_vm8, %v1876_v32, -inf  ;;  %v1881_v34 = vsel %vm1880_vm9, %v2433_v11, -inf }
 0x6d0   : > { %v1882_v16 = vmax.f32 %v1879_v33, %v1881_v34 }
 0x6d2   : > { %1883 = vmax.xlane.f32.xlu1 %v1882_v16 }
 0x75f   : > { %v1884_v37 = vpop.xlane.xlu1 %1883 }
 0x760   : > { %v1885_v35 = vsub.f32 %v1876_v32, %v1884_v37  ;;  %v1886_v38 = vsub.f32 %v2433_v11, %v1884_v37 }
 0x762   : > { %v1887_v39 = vmul.f32 1.442695, %v1885_v35  ;;  %v1889_v40 = vmul.f32 1.442695, %v1886_v38 }
 0x764   : > { %2460 = vpow2.f32 %v1887_v39 }
 0x765   : > { %2462 = vpow2.f32 %v1889_v40 }
 0x76e   : > { %v2461_v41 = vpop.eup %2460 }
 0x76f   : > { %v2463_v42 = vpop.eup %2462  ;;  %v1891_v43 = vsel %vm1874_vm6, %v2461_v41, 0.0 }
 0x770   : > { %v1893_v44 = vsel %vm1878_vm8, %v1891_v43, 0.0  ;;  %v1894_v45 = vsel %vm1880_vm9, %v2463_v42, 0.0 }
 0x771   : > { %v1895_v46 = vadd.f32 %v1894_v45, %v1893_v44 }
 0x773   : > { %1896 = vadd.xlane.f32.xlu0 %v1895_v46 }
 0x800   : > { %v1897_v47 = vpop.xlane.xlu0 %1896 }
 0x801   : > { %2464 = vrcp.f32 %v1897_v47 }
 0x80b   : > { %v2465_v48 = vpop.eup %2464 }
 0x80c   : > { %v1899_v49 = vmul.f32 %v2465_v48, %v1891_v43  ;;  %v1900_v50 = vmul.f32 %v2465_v48, %v2463_v42 }
 0x80e   : > { %v1902_v51 = vsel %vm509_vm11, %v2431_v2, %v1899_v49 }
 0x80f   : > { %v1906_v52 = vcombine.low %v1902_v51, %v1900_v50 }
 0x811   : > { %v1913_v53 = vrot.slane %v1906_v52, %v3097_v31 }
 0x813   : > { %v1920_v54 = vrot.slane %v1913_v53, %v3097_v31 }
 0x815   : > { %1924 = vst.msk [vmem:[%s320_s15] sm:$0x3] %vm1922_vm10, %v1920_v54 }
 0x816 PF: > { %s18_s27 = sadd.s32 1, %s2472_s27  }
 0x817   : > { %p15_p4 = scmp.ge.s32.totalorder %s18_s27, 6  }
 0x819   :  { %17 = sbr.rel (!%p15_p4) target bundleno = 1 (0x1), region = 85 }

</bundles_post_ra>
